<compile_context>
chip_gen: v7x
topology: tpu7x:2x2x1
jax: 0.10.0
libtpu: 0.0.40
codegen_flags: <defaults>
</compile_context>

<pallas_src>
import jax
import jax.numpy as jnp
from jax.experimental import pallas as pl
from jax.experimental.pallas import tpu as pltpu


_CHUNK = 8  # samples per grid step (rows of all 8 are stacked along M)


def _mscnn_kernel(x_ref, wa_ref, wb_ref, w4a_ref, side_ref, pool_ref, out_ref):
    """One grid step: _CHUNK samples, rows stacked along M.

    x_ref   : (3, _CHUNK * n_pad, 50) bf16   stacked branch inputs
    wa_ref  : (3, 50, 512)            bf16   branch layer-1 weights (transposed)
    wb_ref  : (3, 512, 50)            bf16   branch layer-2 weights (transposed)
    w4a_ref : (3, 50, 1024)           bf16   head weight split per-branch
    side_ref: (8, 1024)               f32    packed biases / final weight row
                rows 0-2: [ba_b (512) | bb_b (50) | 0...]
                row  3  : b4a (1024)
                row  4  : w4b row (1024)
                row  5  : [b4b, 0, ...]
    pool_ref: (_CHUNK, _CHUNK * n_pad) f32   per-sample mean operator
                pool[c, r] = 1/n_rows if row r belongs to sample c and is a
                real (un-padded) row, else 0.  Built on the host per call, so
                n_rows is a runtime quantity and padded rows are masked for free.
    out_ref : (_CHUNK, 128)           f32    sigmoid(logit) broadcast over lanes
    """
    pool = pool_ref[...]                                    # (C, M) f32
    acc = side_ref[pl.ds(3, 1), :]                          # (1, 1024) f32 = b4a

    for b in range(3):                                      # 3 branches, unrolled
        ba = side_ref[pl.ds(b, 1), pl.ds(0, 512)]           # (1, 512) f32
        bb = side_ref[pl.ds(b, 1), pl.ds(512, 50)]          # (1, 50)  f32

        h = jnp.dot(x_ref[b], wa_ref[b],
                    preferred_element_type=jnp.float32) + ba
        h = jnp.maximum(h, 0.0)                             # (M, 512) f32
        o = jnp.dot(h.astype(jnp.bfloat16), wb_ref[b],
                    preferred_element_type=jnp.float32) + bb
        o = jnp.maximum(o, 0.0)                             # (M, 50)  f32

        # Per-sample mean over true rows (mask + 1/N folded into `pool`).
        s = jnp.dot(pool, o, preferred_element_type=jnp.float32)   # (C, 50)
        acc = acc + jnp.dot(s.astype(jnp.bfloat16), w4a_ref[b],
                            preferred_element_type=jnp.float32)    # (C, 1024)

    h4 = jnp.maximum(acc, 0.0)                              # (C, 1024)
    w4b = side_ref[pl.ds(4, 1), :]                          # (1, 1024)
    b4b = side_ref[pl.ds(5, 1), pl.ds(0, 1)]                # (1, 1)
    # Linear(1024, 1) as VPU multiply + lane reduce (avoids a degenerate
    # lane-sparse (1024,1) MXU matmul).
    logit = jnp.sum(h4 * w4b, axis=-1, keepdims=True) + b4b  # (C, 1)
    out_ref[...] = jnp.broadcast_to(jax.nn.sigmoid(logit), out_ref.shape)


def _bucket_rows(n):
    b = 8
    while b < n:
        b *= 2
    return b


def _build_pool(n_rows, n_pad):
    """(C, C*n_pad) f32: mean-over-true-rows operator for each sample slot."""
    m = _CHUNK * n_pad
    r = jnp.arange(m, dtype=jnp.int32)
    c = jnp.arange(_CHUNK, dtype=jnp.int32)
    same = (r[None, :] // n_pad) == c[:, None]
    valid = (r[None, :] % n_pad) < n_rows
    return jnp.where(same & valid, 1.0 / float(n_rows), 0.0).astype(jnp.float32)


def _prepare_params(params):
    """Pack/cast params. N-independent -> build once, reuse for every call."""
    bf16 = jnp.bfloat16
    wa = jnp.stack([params["w1a"], params["w2a"], params["w3a"]]).astype(bf16)
    wb = jnp.stack([params["w1b"], params["w2b"], params["w3b"]]).astype(bf16)
    # (150,1024) head weight split into the three 50-row slabs (torch.cat order).
    w4a = params["w4a"].reshape(3, 50, 1024).astype(bf16)

    ba = jnp.stack([params["b1a"], params["b2a"], params["b3a"]]).reshape(3, 512)
    bb = jnp.stack([params["b1b"], params["b2b"], params["b3b"]]).reshape(3, 50)
    side = jnp.zeros((8, 1024), jnp.float32)
    side = side.at[0:3, 0:512].set(ba)
    side = side.at[0:3, 512:562].set(bb)
    side = side.at[3, :].set(params["b4a"].reshape(1024))
    side = side.at[4, :].set(params["w4b"].reshape(1024))
    side = side.at[5, 0].set(params["b4b"].reshape(()))
    return dict(wa=wa, wb=wb, w4a=w4a, side=side)


def mscnn_forward(x, prepped):
    """x: (3, N, 50) f32 (single sample, matches the PyTorch module) or
       (S, 3, N, 50) f32 (batched).  Returns (1,) or (S, 1) sigmoid outputs."""
    single = (x.ndim == 3)
    if single:
        x = x[None]
    s_count, three, n, d = x.shape
    assert three == 3 and d == 50, x.shape

    n_pad = _bucket_rows(n)
    g = -(-s_count // _CHUNK)            # grid steps
    s_pad = g * _CHUNK
    m = _CHUNK * n_pad                   # stacked rows per grid step

    # Layout: (3, S_pad, n_pad, 50) -> (3, S_pad*n_pad, 50), bf16.
    xt = jnp.transpose(x, (1, 0, 2, 3))
    xt = jnp.pad(xt, ((0, 0), (0, s_pad - s_count), (0, n_pad - n), (0, 0)))
    xm = xt.reshape(3, s_pad * n_pad, 50).astype(jnp.bfloat16)

    pool = _build_pool(n, n_pad)         # runtime 1/N + padded-row mask

    flops_per_step = (3 * (2 * m * 50 * 512 + 2 * m * 512 * 50
                           + 2 * _CHUNK * m * 50 + 2 * _CHUNK * 50 * 1024)
                      + 2 * _CHUNK * 1024)
    bytes_accessed = (xm.size * 2
                      + prepped["wa"].size * 2 + prepped["wb"].size * 2
                      + prepped["w4a"].size * 2 + prepped["side"].size * 4
                      + pool.size * 4 + s_pad * 128 * 4)
    ce = pl.CostEstimate(flops=g * flops_per_step,
                         transcendentals=s_pad,
                         bytes_accessed=bytes_accessed)

    out = pl.pallas_call(
        _mscnn_kernel,
        out_shape=jax.ShapeDtypeStruct((s_pad, 128), jnp.float32),
        grid=(g,),
        in_specs=[
            pl.BlockSpec((3, m, 50), lambda i: (0, i, 0)),        # x (streams)
            pl.BlockSpec((3, 50, 512), lambda i: (0, 0, 0)),      # wa (resident)
            pl.BlockSpec((3, 512, 50), lambda i: (0, 0, 0)),      # wb (resident)
            pl.BlockSpec((3, 50, 1024), lambda i: (0, 0, 0)),     # w4a (resident)
            pl.BlockSpec((8, 1024), lambda i: (0, 0)),            # side (resident)
            pl.BlockSpec((_CHUNK, m), lambda i: (0, 0)),          # pool (resident)
        ],
        out_specs=pl.BlockSpec((_CHUNK, 128), lambda i: (i, 0)),
        compiler_params=pltpu.CompilerParams(
            dimension_semantics=("parallel",)),
        cost_estimate=ce,
    )(xm, prepped["wa"], prepped["wb"], prepped["w4a"], prepped["side"], pool)

    probs = out[:s_count, 0]
    if single:
        return probs.reshape((1,))       # matches the PyTorch output shape (1,)
    return probs.reshape((s_count, 1))


def _init_params(seed=0):
    key = jax.random.PRNGKey(seed)
    keys = jax.random.split(key, 16)
    k = iter(keys)

    def lin(kw, kb, fan_in, fan_out):
        bound = 1.0 / jnp.sqrt(float(fan_in))
        w = jax.random.uniform(kw, (fan_in, fan_out), jnp.float32, -bound, bound)
        b = jax.random.uniform(kb, (1, fan_out), jnp.float32, -bound, bound)
        return w, b

    p = {}
    p["w1a"], p["b1a"] = lin(next(k), next(k), 50, 512)
    p["w1b"], p["b1b"] = lin(next(k), next(k), 512, 50)
    p["w2a"], p["b2a"] = lin(next(k), next(k), 50, 512)
    p["w2b"], p["b2b"] = lin(next(k), next(k), 512, 50)
    p["w3a"], p["b3a"] = lin(next(k), next(k), 50, 512)
    p["w3b"], p["b3b"] = lin(next(k), next(k), 512, 50)
    p["w4a"], p["b4a"] = lin(next(k), next(k), 150, 1024)
    p["w4b"], p["b4b"] = lin(next(k), next(k), 1024, 1)
    return p


def _reference_f32(x, p):
    """Exact PyTorch-module semantics in f32 (loose-tolerance check)."""
    def stack(xb, wa, ba, wb, bb):
        h = jnp.maximum(xb @ wa + ba, 0.0)
        return jnp.maximum(h @ wb + bb, 0.0)

    l1 = jnp.mean(stack(x[0], p["w1a"], p["b1a"], p["w1b"], p["b1b"]), axis=0)
    l2 = jnp.mean(stack(x[1], p["w2a"], p["b2a"], p["w2b"], p["b2b"]), axis=0)
    l3 = jnp.mean(stack(x[2], p["w3a"], p["b3a"], p["w3b"], p["b3b"]), axis=0)
    cat = jnp.concatenate([l1, l2, l3])                        # (150,)
    h4 = jnp.maximum(cat @ p["w4a"] + p["b4a"][0], 0.0)        # (1024,)
    return jax.nn.sigmoid(h4 @ p["w4b"] + p["b4b"][0])         # (1,)


def _reference_bf16(x, prepped):
    """Mirrors the kernel's bf16-weight / f32-accumulate math (tight check)."""
    side = prepped["side"]
    acc = side[3:4, :]
    for b in range(3):
        xb = x[b].astype(jnp.bfloat16)
        h = jnp.dot(xb, prepped["wa"][b],
                    preferred_element_type=jnp.float32) + side[b:b + 1, 0:512]
        h = jnp.maximum(h, 0.0)
        o = jnp.dot(h.astype(jnp.bfloat16), prepped["wb"][b],
                    preferred_element_type=jnp.float32) + side[b:b + 1, 512:562]
        o = jnp.maximum(o, 0.0)
        s = jnp.mean(o, axis=0, keepdims=True)
        acc = acc + jnp.dot(s.astype(jnp.bfloat16), prepped["w4a"][b],
                            preferred_element_type=jnp.float32)
    h4 = jnp.maximum(acc, 0.0)
    logit = jnp.sum(h4 * side[4:5, :], axis=-1, keepdims=True) + side[5, 0]
    return jax.nn.sigmoid(logit).reshape((1,))


if __name__ == "__main__":
    params = _init_params(seed=0)
    prepped = _prepare_params(params)   # N-independent: built once, reused

    # Single-sample calls: N=8 (aligned bucket) and N=13 (padded to 16).
    for n_rows in (8, 13):
        x = jax.random.normal(jax.random.PRNGKey(0), (3, n_rows, 50),
                              dtype=jnp.float32)
        out = jax.block_until_ready(mscnn_forward(x, prepped))
        ref16 = _reference_bf16(x, prepped)
        ref32 = _reference_f32(x, params)
        assert out.shape == (1,), out.shape
        assert jnp.allclose(out, ref16, atol=2e-3, rtol=2e-3), (n_rows, out, ref16)
        assert jnp.allclose(out, ref32, atol=2e-2, rtol=2e-2), (n_rows, out, ref32)

    # Batched call: 5 samples, N=13 -> one grid step over an 8-sample chunk.
    xb = jax.random.normal(jax.random.PRNGKey(1), (5, 3, 13, 50),
                           dtype=jnp.float32)
    outb = jax.block_until_ready(mscnn_forward(xb, prepped))
    assert outb.shape == (5, 1), outb.shape
    for i in range(5):
        ref16 = _reference_bf16(xb[i], prepped)
        assert jnp.allclose(outb[i], ref16, atol=2e-3, rtol=2e-3), (i, outb[i], ref16)

    # Larger batch: multiple grid steps (exercises streaming x / megacore path).
    xl = jax.random.normal(jax.random.PRNGKey(2), (20, 3, 13, 50),
                           dtype=jnp.float32)
    outl = jax.block_until_ready(mscnn_forward(xl, prepped))
    assert outl.shape == (20, 1), outl.shape
    for i in (0, 7, 19):
        ref16 = _reference_bf16(xl[i], prepped)
        assert jnp.allclose(outl[i], ref16, atol=2e-3, rtol=2e-3), (i, outl[i], ref16)

    print("KERNEL_OK")
</pallas_src>

<mosaic_0001>
module attributes {stable_mosaic.version = 11 : i64} {
  func.func @_mscnn_kernel(%arg0: i32, %arg1: memref<3x64x50xbf16, #tpu.memory_space<vmem>>, %arg2: memref<3x50x512xbf16, #tpu.memory_space<vmem>>, %arg3: memref<3x512x50xbf16, #tpu.memory_space<vmem>>, %arg4: memref<3x50x1024xbf16, #tpu.memory_space<vmem>>, %arg5: memref<8x1024xf32, #tpu.memory_space<vmem>>, %arg6: memref<8x64xf32, #tpu.memory_space<vmem>>, %arg7: memref<8x128xf32, #tpu.memory_space<vmem>>) attributes {dimension_semantics = [#tpu.dimension_semantics<parallel>], iteration_bounds = array<i64: 1>, scalar_prefetch = 0 : i64, scratch_operands = 0 : i64, tpu.core_type = #tpu.core_type<tc>, window_params = [{transform_indices = @transform_0, window_bounds = array<i64: 3, 64, 50>}, {pipeline_mode = #tpu.pipeline_mode<synchronous>, transform_indices = @transform_1, window_bounds = array<i64: 3, 50, 512>}, {pipeline_mode = #tpu.pipeline_mode<synchronous>, transform_indices = @transform_2, window_bounds = array<i64: 3, 512, 50>}, {pipeline_mode = #tpu.pipeline_mode<synchronous>, transform_indices = @transform_3, window_bounds = array<i64: 3, 50, 1024>}, {pipeline_mode = #tpu.pipeline_mode<synchronous>, transform_indices = @transform_4, window_bounds = array<i64: 8, 1024>}, {pipeline_mode = #tpu.pipeline_mode<synchronous>, transform_indices = @transform_5, window_bounds = array<i64: 8, 64>}, {transform_indices = @transform_6, window_bounds = array<i64: 8, 128>}]} {
    %c0 = arith.constant 0 : index
    %c0_0 = arith.constant 0 : index
    %0 = vector.load %arg6[%c0, %c0_0] : memref<8x64xf32, #tpu.memory_space<vmem>>, vector<8x64xf32>
    %c3 = arith.constant 3 : index
    %c0_1 = arith.constant 0 : index
    %1 = vector.load %arg5[%c3, %c0_1] : memref<8x1024xf32, #tpu.memory_space<vmem>>, vector<1x1024xf32>
    %c0_2 = arith.constant 0 : index
    %c0_3 = arith.constant 0 : index
    %2 = vector.load %arg5[%c0_2, %c0_3] : memref<8x1024xf32, #tpu.memory_space<vmem>>, vector<1x512xf32>
    %c0_4 = arith.constant 0 : index
    %c512 = arith.constant 512 : index
    %3 = vector.load %arg5[%c0_4, %c512] : memref<8x1024xf32, #tpu.memory_space<vmem>>, vector<1x50xf32>
    %c0_5 = arith.constant 0 : index
    %c0_6 = arith.constant 0 : index
    %c0_7 = arith.constant 0 : index
    %4 = vector.load %arg1[%c0_5, %c0_6, %c0_7] : memref<3x64x50xbf16, #tpu.memory_space<vmem>>, vector<1x64x50xbf16>
    %5 = vector.shape_cast %4 : vector<1x64x50xbf16> to vector<64x50xbf16>
    %c0_8 = arith.constant 0 : index
    %c0_9 = arith.constant 0 : index
    %c0_10 = arith.constant 0 : index
    %6 = vector.load %arg2[%c0_8, %c0_9, %c0_10] : memref<3x50x512xbf16, #tpu.memory_space<vmem>>, vector<1x50x512xbf16>
    %7 = vector.shape_cast %6 : vector<1x50x512xbf16> to vector<50x512xbf16>
    %cst = arith.constant dense<0.000000e+00> : vector<64x512xf32>
    %8 = tpu.matmul %5, %7, %cst {dimension_numbers = #tpu.dot_dimension_numbers<[1], [0], [0], [1], [0, 0, 1, 1], [], []>} : vector<64x50xbf16>, vector<50x512xbf16>, vector<64x512xf32> -> vector<64x512xf32>
    %9 = vector.broadcast %2 : vector<1x512xf32> to vector<64x512xf32>
    %10 = arith.addf %8, %9 : vector<64x512xf32>
    %cst_11 = arith.constant 0.000000e+00 : f32
    %11 = vector.broadcast %cst_11 : f32 to vector<64x512xf32>
    %12 = arith.maximumf %10, %11 : vector<64x512xf32>
    %13 = arith.truncf %12 : vector<64x512xf32> to vector<64x512xbf16>
    %c0_12 = arith.constant 0 : index
    %c0_13 = arith.constant 0 : index
    %c0_14 = arith.constant 0 : index
    %14 = vector.load %arg3[%c0_12, %c0_13, %c0_14] : memref<3x512x50xbf16, #tpu.memory_space<vmem>>, vector<1x512x50xbf16>
    %15 = vector.shape_cast %14 : vector<1x512x50xbf16> to vector<512x50xbf16>
    %cst_15 = arith.constant dense<0.000000e+00> : vector<64x50xf32>
    %16 = tpu.matmul %13, %15, %cst_15 {dimension_numbers = #tpu.dot_dimension_numbers<[1], [0], [0], [1], [0, 0, 1, 1], [], []>} : vector<64x512xbf16>, vector<512x50xbf16>, vector<64x50xf32> -> vector<64x50xf32>
    %17 = vector.broadcast %3 : vector<1x50xf32> to vector<64x50xf32>
    %18 = arith.addf %16, %17 : vector<64x50xf32>
    %cst_16 = arith.constant 0.000000e+00 : f32
    %19 = vector.broadcast %cst_16 : f32 to vector<64x50xf32>
    %20 = arith.maximumf %18, %19 : vector<64x50xf32>
    %cst_17 = arith.constant dense<0.000000e+00> : vector<8x50xf32>
    %21 = tpu.matmul %0, %20, %cst_17 {dimension_numbers = #tpu.dot_dimension_numbers<[1], [0], [0], [1], [0, 0, 1, 1], [], []>} : vector<8x64xf32>, vector<64x50xf32>, vector<8x50xf32> -> vector<8x50xf32>
    %22 = arith.truncf %21 : vector<8x50xf32> to vector<8x50xbf16>
    %c0_18 = arith.constant 0 : index
    %c0_19 = arith.constant 0 : index
    %c0_20 = arith.constant 0 : index
    %23 = vector.load %arg4[%c0_18, %c0_19, %c0_20] : memref<3x50x1024xbf16, #tpu.memory_space<vmem>>, vector<1x50x1024xbf16>
    %24 = vector.shape_cast %23 : vector<1x50x1024xbf16> to vector<50x1024xbf16>
    %cst_21 = arith.constant dense<0.000000e+00> : vector<8x1024xf32>
    %25 = tpu.matmul %22, %24, %cst_21 {dimension_numbers = #tpu.dot_dimension_numbers<[1], [0], [0], [1], [0, 0, 1, 1], [], []>} : vector<8x50xbf16>, vector<50x1024xbf16>, vector<8x1024xf32> -> vector<8x1024xf32>
    %26 = vector.broadcast %1 : vector<1x1024xf32> to vector<8x1024xf32>
    %27 = arith.addf %26, %25 : vector<8x1024xf32>
    %c1 = arith.constant 1 : index
    %c0_22 = arith.constant 0 : index
    %28 = vector.load %arg5[%c1, %c0_22] : memref<8x1024xf32, #tpu.memory_space<vmem>>, vector<1x512xf32>
    %c1_23 = arith.constant 1 : index
    %c512_24 = arith.constant 512 : index
    %29 = vector.load %arg5[%c1_23, %c512_24] : memref<8x1024xf32, #tpu.memory_space<vmem>>, vector<1x50xf32>
    %c1_25 = arith.constant 1 : index
    %c0_26 = arith.constant 0 : index
    %c0_27 = arith.constant 0 : index
    %30 = vector.load %arg1[%c1_25, %c0_26, %c0_27] : memref<3x64x50xbf16, #tpu.memory_space<vmem>>, vector<1x64x50xbf16>
    %31 = vector.shape_cast %30 : vector<1x64x50xbf16> to vector<64x50xbf16>
    %c1_28 = arith.constant 1 : index
    %c0_29 = arith.constant 0 : index
    %c0_30 = arith.constant 0 : index
    %32 = vector.load %arg2[%c1_28, %c0_29, %c0_30] : memref<3x50x512xbf16, #tpu.memory_space<vmem>>, vector<1x50x512xbf16>
    %33 = vector.shape_cast %32 : vector<1x50x512xbf16> to vector<50x512xbf16>
    %cst_31 = arith.constant dense<0.000000e+00> : vector<64x512xf32>
    %34 = tpu.matmul %31, %33, %cst_31 {dimension_numbers = #tpu.dot_dimension_numbers<[1], [0], [0], [1], [0, 0, 1, 1], [], []>} : vector<64x50xbf16>, vector<50x512xbf16>, vector<64x512xf32> -> vector<64x512xf32>
    %35 = vector.broadcast %28 : vector<1x512xf32> to vector<64x512xf32>
    %36 = arith.addf %34, %35 : vector<64x512xf32>
    %cst_32 = arith.constant 0.000000e+00 : f32
    %37 = vector.broadcast %cst_32 : f32 to vector<64x512xf32>
    %38 = arith.maximumf %36, %37 : vector<64x512xf32>
    %39 = arith.truncf %38 : vector<64x512xf32> to vector<64x512xbf16>
    %c1_33 = arith.constant 1 : index
    %c0_34 = arith.constant 0 : index
    %c0_35 = arith.constant 0 : index
    %40 = vector.load %arg3[%c1_33, %c0_34, %c0_35] : memref<3x512x50xbf16, #tpu.memory_space<vmem>>, vector<1x512x50xbf16>
    %41 = vector.shape_cast %40 : vector<1x512x50xbf16> to vector<512x50xbf16>
    %cst_36 = arith.constant dense<0.000000e+00> : vector<64x50xf32>
    %42 = tpu.matmul %39, %41, %cst_36 {dimension_numbers = #tpu.dot_dimension_numbers<[1], [0], [0], [1], [0, 0, 1, 1], [], []>} : vector<64x512xbf16>, vector<512x50xbf16>, vector<64x50xf32> -> vector<64x50xf32>
    %43 = vector.broadcast %29 : vector<1x50xf32> to vector<64x50xf32>
    %44 = arith.addf %42, %43 : vector<64x50xf32>
    %cst_37 = arith.constant 0.000000e+00 : f32
    %45 = vector.broadcast %cst_37 : f32 to vector<64x50xf32>
    %46 = arith.maximumf %44, %45 : vector<64x50xf32>
    %cst_38 = arith.constant dense<0.000000e+00> : vector<8x50xf32>
    %47 = tpu.matmul %0, %46, %cst_38 {dimension_numbers = #tpu.dot_dimension_numbers<[1], [0], [0], [1], [0, 0, 1, 1], [], []>} : vector<8x64xf32>, vector<64x50xf32>, vector<8x50xf32> -> vector<8x50xf32>
    %48 = arith.truncf %47 : vector<8x50xf32> to vector<8x50xbf16>
    %c1_39 = arith.constant 1 : index
    %c0_40 = arith.constant 0 : index
    %c0_41 = arith.constant 0 : index
    %49 = vector.load %arg4[%c1_39, %c0_40, %c0_41] : memref<3x50x1024xbf16, #tpu.memory_space<vmem>>, vector<1x50x1024xbf16>
    %50 = vector.shape_cast %49 : vector<1x50x1024xbf16> to vector<50x1024xbf16>
    %cst_42 = arith.constant dense<0.000000e+00> : vector<8x1024xf32>
    %51 = tpu.matmul %48, %50, %cst_42 {dimension_numbers = #tpu.dot_dimension_numbers<[1], [0], [0], [1], [0, 0, 1, 1], [], []>} : vector<8x50xbf16>, vector<50x1024xbf16>, vector<8x1024xf32> -> vector<8x1024xf32>
    %52 = arith.addf %27, %51 : vector<8x1024xf32>
    %c2 = arith.constant 2 : index
    %c0_43 = arith.constant 0 : index
    %53 = vector.load %arg5[%c2, %c0_43] : memref<8x1024xf32, #tpu.memory_space<vmem>>, vector<1x512xf32>
    %c2_44 = arith.constant 2 : index
    %c512_45 = arith.constant 512 : index
    %54 = vector.load %arg5[%c2_44, %c512_45] : memref<8x1024xf32, #tpu.memory_space<vmem>>, vector<1x50xf32>
    %c2_46 = arith.constant 2 : index
    %c0_47 = arith.constant 0 : index
    %c0_48 = arith.constant 0 : index
    %55 = vector.load %arg1[%c2_46, %c0_47, %c0_48] : memref<3x64x50xbf16, #tpu.memory_space<vmem>>, vector<1x64x50xbf16>
    %56 = vector.shape_cast %55 : vector<1x64x50xbf16> to vector<64x50xbf16>
    %c2_49 = arith.constant 2 : index
    %c0_50 = arith.constant 0 : index
    %c0_51 = arith.constant 0 : index
    %57 = vector.load %arg2[%c2_49, %c0_50, %c0_51] : memref<3x50x512xbf16, #tpu.memory_space<vmem>>, vector<1x50x512xbf16>
    %58 = vector.shape_cast %57 : vector<1x50x512xbf16> to vector<50x512xbf16>
    %cst_52 = arith.constant dense<0.000000e+00> : vector<64x512xf32>
    %59 = tpu.matmul %56, %58, %cst_52 {dimension_numbers = #tpu.dot_dimension_numbers<[1], [0], [0], [1], [0, 0, 1, 1], [], []>} : vector<64x50xbf16>, vector<50x512xbf16>, vector<64x512xf32> -> vector<64x512xf32>
    %60 = vector.broadcast %53 : vector<1x512xf32> to vector<64x512xf32>
    %61 = arith.addf %59, %60 : vector<64x512xf32>
    %cst_53 = arith.constant 0.000000e+00 : f32
    %62 = vector.broadcast %cst_53 : f32 to vector<64x512xf32>
    %63 = arith.maximumf %61, %62 : vector<64x512xf32>
    %64 = arith.truncf %63 : vector<64x512xf32> to vector<64x512xbf16>
    %c2_54 = arith.constant 2 : index
    %c0_55 = arith.constant 0 : index
    %c0_56 = arith.constant 0 : index
    %65 = vector.load %arg3[%c2_54, %c0_55, %c0_56] : memref<3x512x50xbf16, #tpu.memory_space<vmem>>, vector<1x512x50xbf16>
    %66 = vector.shape_cast %65 : vector<1x512x50xbf16> to vector<512x50xbf16>
    %cst_57 = arith.constant dense<0.000000e+00> : vector<64x50xf32>
    %67 = tpu.matmul %64, %66, %cst_57 {dimension_numbers = #tpu.dot_dimension_numbers<[1], [0], [0], [1], [0, 0, 1, 1], [], []>} : vector<64x512xbf16>, vector<512x50xbf16>, vector<64x50xf32> -> vector<64x50xf32>
    %68 = vector.broadcast %54 : vector<1x50xf32> to vector<64x50xf32>
    %69 = arith.addf %67, %68 : vector<64x50xf32>
    %cst_58 = arith.constant 0.000000e+00 : f32
    %70 = vector.broadcast %cst_58 : f32 to vector<64x50xf32>
    %71 = arith.maximumf %69, %70 : vector<64x50xf32>
    %cst_59 = arith.constant dense<0.000000e+00> : vector<8x50xf32>
    %72 = tpu.matmul %0, %71, %cst_59 {dimension_numbers = #tpu.dot_dimension_numbers<[1], [0], [0], [1], [0, 0, 1, 1], [], []>} : vector<8x64xf32>, vector<64x50xf32>, vector<8x50xf32> -> vector<8x50xf32>
    %73 = arith.truncf %72 : vector<8x50xf32> to vector<8x50xbf16>
    %c2_60 = arith.constant 2 : index
    %c0_61 = arith.constant 0 : index
    %c0_62 = arith.constant 0 : index
    %74 = vector.load %arg4[%c2_60, %c0_61, %c0_62] : memref<3x50x1024xbf16, #tpu.memory_space<vmem>>, vector<1x50x1024xbf16>
    %75 = vector.shape_cast %74 : vector<1x50x1024xbf16> to vector<50x1024xbf16>
    %cst_63 = arith.constant dense<0.000000e+00> : vector<8x1024xf32>
    %76 = tpu.matmul %73, %75, %cst_63 {dimension_numbers = #tpu.dot_dimension_numbers<[1], [0], [0], [1], [0, 0, 1, 1], [], []>} : vector<8x50xbf16>, vector<50x1024xbf16>, vector<8x1024xf32> -> vector<8x1024xf32>
    %77 = arith.addf %52, %76 : vector<8x1024xf32>
    %cst_64 = arith.constant 0.000000e+00 : f32
    %78 = vector.broadcast %cst_64 : f32 to vector<8x1024xf32>
    %79 = arith.maximumf %77, %78 : vector<8x1024xf32>
    %c4 = arith.constant 4 : index
    %c0_65 = arith.constant 0 : index
    %80 = vector.load %arg5[%c4, %c0_65] : memref<8x1024xf32, #tpu.memory_space<vmem>>, vector<1x1024xf32>
    %c5 = arith.constant 5 : index
    %c0_66 = arith.constant 0 : index
    %81 = vector.load %arg5[%c5, %c0_66] : memref<8x1024xf32, #tpu.memory_space<vmem>>, vector<1x1xf32>
    %82 = vector.broadcast %80 : vector<1x1024xf32> to vector<8x1024xf32>
    %83 = arith.mulf %79, %82 : vector<8x1024xf32>
    %cst_67 = arith.constant dense<0.000000e+00> : vector<8xf32>
    %84 = vector.multi_reduction <add>, %83, %cst_67 [1] : vector<8x1024xf32> to vector<8xf32>
    %85 = vector.shape_cast %84 : vector<8xf32> to vector<8x1xf32>
    %86 = vector.broadcast %81 : vector<1x1xf32> to vector<8x1xf32>
    %87 = arith.addf %85, %86 : vector<8x1xf32>
    %88 = arith.negf %87 : vector<8x1xf32>
    %89 = math.exp %88 : vector<8x1xf32>
    %cst_68 = arith.constant 1.000000e+00 : f32
    %90 = vector.broadcast %cst_68 : f32 to vector<8x1xf32>
    %91 = arith.addf %90, %89 : vector<8x1xf32>
    %92 = arith.divf %90, %91 : vector<8x1xf32>
    %93 = vector.shape_cast %92 : vector<8x1xf32> to vector<8x1xf32>
    %94 = vector.broadcast %93 : vector<8x1xf32> to vector<8x128xf32>
    %c0_69 = arith.constant 0 : index
    %c0_70 = arith.constant 0 : index
    %95 = vector.load %arg7[%c0_69, %c0_70] : memref<8x128xf32, #tpu.memory_space<vmem>>, vector<8x128xf32>
    tpu.vector_store %arg7[%c0_69, %c0_70], %94 {strides = array<i32>} : memref<8x128xf32, #tpu.memory_space<vmem>>, vector<8x128xf32>,
    return
  }
  func.func @transform_0(%arg0: i32) -> (i32, i32, i32) {
    %c0_i32 = arith.constant 0 : i32
    %c0_i32_0 = arith.constant 0 : i32
    %c0_i32_1 = arith.constant 0 : i32
    return %c0_i32, %arg0, %c0_i32_0 : i32, i32, i32
  }
  func.func @transform_1(%arg0: i32) -> (i32, i32, i32) {
    %c0_i32 = arith.constant 0 : i32
    %c0_i32_0 = arith.constant 0 : i32
    %c0_i32_1 = arith.constant 0 : i32
    %c0_i32_2 = arith.constant 0 : i32
    return %c0_i32, %c0_i32_0, %c0_i32_1 : i32, i32, i32
  }
  func.func @transform_2(%arg0: i32) -> (i32, i32, i32) {
    %c0_i32 = arith.constant 0 : i32
    %c0_i32_0 = arith.constant 0 : i32
    %c0_i32_1 = arith.constant 0 : i32
    %c0_i32_2 = arith.constant 0 : i32
    return %c0_i32, %c0_i32_0, %c0_i32_1 : i32, i32, i32
  }
  func.func @transform_3(%arg0: i32) -> (i32, i32, i32) {
    %c0_i32 = arith.constant 0 : i32
    %c0_i32_0 = arith.constant 0 : i32
    %c0_i32_1 = arith.constant 0 : i32
    %c0_i32_2 = arith.constant 0 : i32
    return %c0_i32, %c0_i32_0, %c0_i32_1 : i32, i32, i32
  }
  func.func @transform_4(%arg0: i32) -> (i32, i32) {
    %c0_i32 = arith.constant 0 : i32
    %c0_i32_0 = arith.constant 0 : i32
    %c0_i32_1 = arith.constant 0 : i32
    return %c0_i32, %c0_i32_0 : i32, i32
  }
  func.func @transform_5(%arg0: i32) -> (i32, i32) {
    %c0_i32 = arith.constant 0 : i32
    %c0_i32_0 = arith.constant 0 : i32
    %c0_i32_1 = arith.constant 0 : i32
    return %c0_i32, %c0_i32_0 : i32, i32
  }
  func.func @transform_6(%arg0: i32) -> (i32, i32) {
    %c0_i32 = arith.constant 0 : i32
    %c0_i32_0 = arith.constant 0 : i32
    return %arg0, %c0_i32 : i32, i32
  }
}

</mosaic_0001>

<bundles_post_ra>
// kernel: tpu_custom_call.1
= control target key start
LH: loop header
LB: loop body
LE: loop exit
PB: predicated region body
PF: predicated region fallthrough
CT: control target
= control target key end

     0   :  { %v4917_v2 = vmov 0   ;;  %vm178_vm0 = vcmask 1040384   ;;  %vm165_vm1 = vcmask 408576   ;;  %s6032_s0 = inlined_call_operand.vmem [shape: bf16[3,64,50], index: 0, kind: input, shape index: {}]   ;;  %s6033_s1 = inlined_call_operand.vmem [shape: bf16[3,50,512], index: 1, kind: input, shape index: {}]   ;;  %s6034_s2 = inlined_call_operand.vmem [shape: bf16[3,512,50], index: 2, kind: input, shape index: {}]   ;;  %s6035_s3 = inlined_call_operand.vmem [shape: bf16[3,50,1024], index: 3, kind: input, shape index: {}]   ;;  %s6036_s4 = inlined_call_operand.vmem [shape: f32[8,1024], index: 4, kind: input, shape index: {}]   ;;  %s6037_s5 = inlined_call_operand.vmem [shape: f32[8,64], index: 5, kind: input, shape index: {}]   ;;  %s6038_s6 = inlined_call_operand.hbm [shape: f32[8,128], index: 6, kind: output, shape index: {}]  }
   0x1   :  { %v4690_v0 = vld [vmem:[%s6033_s1 + $0x4] ss:$16 sps:$4 sm:$0xff]   ;;  %v4692_v1 = vld [vmem:[%s6033_s1 + $0xc] ss:$16 sps:$4 sm:$0xff]   ;;  %223 = vmatprep.mubr.bf16.mxu0 %v4917_v2  ;;  %296 = vmatprep.mubr.bf16.mxu1 %v4917_v2  ;;  %v4694_v3 = vld [vmem:[%s6033_s1] ss:$16 sps:$4 sm:$0xff]  }
   0x2   :  { %191 = vmatprep.subr.bf16.mxu0 %v4690_v0  ;;  %v4695_v4 = vld [vmem:[%s6033_s1 + $0x8] ss:$16 sps:$4 sm:$0xff]   ;;  %4689 = vset.pattern.permute.xlu0 %v4917_v2  ;;  %v4696_v5 = vld [vmem:[%s6033_s1 + $0x24] ss:$16 sps:$4 sm:$0xff]   ;;  %v4698_v6 = vld [vmem:[%s6033_s1 + $0x2c] ss:$16 sps:$4 sm:$0xff]  }
   0x3   :  { %264 = vmatprep.subr.bf16.mxu1 %v4692_v1  ;;  %192 = vmatpush1.bf16.msra.mxu0 %v4694_v3  ;;  %v4700_v7 = vld [vmem:[%s6033_s1 + $0x20] ss:$16 sps:$4 sm:$0xff]   ;;  %v4701_v8 = vld [vmem:[%s6033_s1 + $0x28] ss:$16 sps:$4 sm:$0xff]   ;;  %v4702_v9 = vld [vmem:[%s6033_s1 + $0x44] ss:$16 sps:$4 sm:$0xff]  }
   0x4   :  { %265 = vmatpush1.bf16.msra.mxu1 %v4695_v4  ;;  %193 = vmatprep.subr.bf16.mxu0 %v4696_v5  ;;  %v4704_v10 = vld [vmem:[%s6033_s1 + $0x4c] ss:$16 sps:$4 sm:$0xff]   ;;  %v4706_v11 = vld [vmem:[%s6033_s1 + $0x40] ss:$16 sps:$4 sm:$0xff]   ;;  %v4707_v12 = vld [vmem:[%s6033_s1 + $0x48] ss:$16 sps:$4 sm:$0xff]  }
   0x5   :  { %266 = vmatprep.subr.bf16.mxu1 %v4698_v6  ;;  %v52_v13 = vld [vmem:[%s6033_s1 + $0x60] sm:$0x11]  ;;  %v53_v14 = vld [vmem:[%s6033_s1 + $0x68] sm:$0x11]  ;;  %v4724_v31 = vld [vmem:[%s6034_s2 + $0x50] sm:$0xff]  }
   0x6   :  { %v3759_v15 = vcombine.high %v52_v13, %v52_v13  ;;  %v3761_v16 = vcombine.high %v53_v14, %v53_v14  ;;  %v3758_v17 = vcombine.low %v52_v13, %v52_v13  ;;  %v3760_v18 = vcombine.low %v53_v14, %v53_v14  ;;  %v4712_v21 = vld [vmem:[%s6032_s0] sm:$0xff]   ;;  %v4720_v26 = vld [vmem:[%s6034_s2 + $0x48] sm:$0xff]   ;;  %v4725_v32 = vld [vmem:[%s6034_s2 + $0xd0] sm:$0xff]  }
   0x7   :  { %194 = vmatpush1.bf16.msra.mxu0 %v4700_v7  ;;  %v4716_v22 = vld [vmem:[%s6034_s2 + $0x40] sm:$0xff]   ;;  %v4721_v27 = vld [vmem:[%s6034_s2 + $0xc8] sm:$0xff]   ;;  %v4726_v33 = vld [vmem:[%s6034_s2 + $0x10] sm:$0xff]  }
   0x8   :  { %267 = vmatpush1.bf16.msra.mxu1 %v4701_v8  ;;  %195 = vmatprep.subr.bf16.mxu0 %v4702_v9  ;;  %v180_v19 = vsel %vm178_vm0, %v3758_v17, 0  ;;  %v186_v20 = vsel %vm178_vm0, %v3760_v18, 0  ;;  %v4717_v23 = vld [vmem:[%s6034_s2 + $0xc0] sm:$0xff]   ;;  %v4722_v28 = vld [vmem:[%s6034_s2 + $0x8] sm:$0xff]   ;;  %v4727_v34 = vld [vmem:[%s6034_s2 + $0x90] sm:$0xff]  }
   0x9   :  { %268 = vmatprep.subr.bf16.mxu1 %v4704_v10  ;;  %v4718_v24 = vld [vmem:[%s6034_s2] sm:$0xff]   ;;  %v4723_v29 = vld [vmem:[%s6034_s2 + $0x88] sm:$0xff]   ;;  %v4728_v35 = vld [vmem:[%s6034_s2 + $0x58] sm:$0xff]  }
   0xa   :  { %v4719_v25 = vld [vmem:[%s6034_s2 + $0x80] sm:$0xff]   ;;  %v4713_v30 = vld [vmem:[%s6032_s0 + $0x8] sm:$0xff]   ;;  %v4729_v36 = vld [vmem:[%s6034_s2 + $0xd8] sm:$0xff]  }
   0xb   :  { %196 = vmatpush1.bf16.msra.mxu0 %v4706_v11  ;;  %v4730_v37 = vld [vmem:[%s6034_s2 + $0x18] sm:$0xff]   ;;  %v4732_v39 = vld [vmem:[%s6034_s2 + $0x60] sm:$0xff]   ;;  %v4714_v41 = vld [vmem:[%s6032_s0 + $0x10] sm:$0xff]  }
   0xc   :  { %269 = vmatpush1.bf16.msra.mxu1 %v4707_v12  ;;  %3762 = vmatprep.subr.msk.bf16.mxu0 %vm178_vm0, %v3759_v15  ;;  %v4731_v38 = vld [vmem:[%s6034_s2 + $0x98] sm:$0xff]   ;;  %v4733_v40 = vld [vmem:[%s6034_s2 + $0xe0] sm:$0xff]   ;;  %v4736_v44 = vld [vmem:[%s6034_s2 + $0x68] sm:$0xff]  }
   0xd   :  { %3767 = vmatprep.subr.msk.bf16.mxu1 %vm178_vm0, %v3761_v16  ;;  %v4734_v42 = vld [vmem:[%s6034_s2 + $0x20] sm:$0xff]   ;;  %v4737_v45 = vld [vmem:[%s6034_s2 + $0xe8] sm:$0xff]   ;;  %v4715_v46 = vld [vmem:[%s6032_s0 + $0x18] sm:$0xff]  }
   0xe   :  { %v4735_v43 = vld [vmem:[%s6034_s2 + $0xa0] sm:$0xff]  }
   0xf   :  { %198 = vmatpush1.bf16.msra.mxu0 %v180_v19 }
  0x10   :  { %271 = vmatpush1.bf16.msra.mxu1 %v186_v20  ;;  %4284 = vmatprep.subr.bf16.mxu0 %v4716_v22 }
  0x11   :  { %4324 = vmatprep.subr.bf16.mxu1 %v4717_v23 }
  0x12   :  { %3763 = vmatmul.mubr.msk.bf16.vlgmr.msra.gmra.mrb[0].mxu0 %vm165_vm1, %v4712_v21 }
  0x13   :  { %3768 = vmatmul.mubr.msk.bf16.vlgmr.msra.gmra.mrb[0].mxu1 %vm165_vm1, %v4712_v21  ;;  %233 = vmatprep.mubr.bf16.mxu0 %v4917_v2 }
  0x14   :  { %306 = vmatprep.mubr.bf16.mxu1 %v4917_v2  ;;  %4285 = vmatpush3.bf16.msra.mxu0 %v4718_v24 }
  0x15   :  { %4325 = vmatpush3.bf16.msra.mxu1 %v4719_v25  ;;  %4286 = vmatprep.subr.bf16.mxu0 %v4720_v26 }
  0x16   :  { %4326 = vmatprep.subr.bf16.mxu1 %v4721_v27 }
  0x18   :  { %4287 = vmatpush3.bf16.msra.mxu0 %v4722_v28 }
  0x19   :  { %4327 = vmatpush3.bf16.msra.mxu1 %v4723_v29  ;;  %4288 = vmatprep.subr.bf16.mxu0 %v4724_v31 }
  0x1a   :  { %4328 = vmatprep.subr.bf16.mxu1 %v4725_v32  ;;  %3764 = vmatmul.mubr.msk.bf16.gmra.mrb[4].mxu0 %vm165_vm1, %v4713_v30 }
  0x1b   :  { %3769 = vmatmul.mubr.msk.bf16.gmra.mrb[4].mxu1 %vm165_vm1, %v4713_v30  ;;  %243 = vmatprep.mubr.bf16.mxu0 %v4917_v2 }
  0x1c   :  { %316 = vmatprep.mubr.bf16.mxu1 %v4917_v2  ;;  %4289 = vmatpush3.bf16.msra.mxu0 %v4726_v33 }
  0x1d   :  { %4329 = vmatpush3.bf16.msra.mxu1 %v4727_v34  ;;  %4290 = vmatprep.subr.bf16.mxu0 %v4728_v35 }
  0x1e   :  { %4330 = vmatprep.subr.bf16.mxu1 %v4729_v36 }
  0x20   :  { %4291 = vmatpush3.bf16.msra.mxu0 %v4730_v37 }
  0x21   :  { %4331 = vmatpush3.bf16.msra.mxu1 %v4731_v38  ;;  %4292 = vmatprep.subr.bf16.mxu0 %v4732_v39 }
  0x22   :  { %4332 = vmatprep.subr.bf16.mxu1 %v4733_v40  ;;  %3765 = vmatmul.mubr.msk.bf16.gmra.mrb[8].mxu0 %vm165_vm1, %v4714_v41 }
  0x23   :  { %3770 = vmatmul.mubr.msk.bf16.gmra.mrb[8].mxu1 %vm165_vm1, %v4714_v41  ;;  %253 = vmatprep.mubr.bf16.mxu0 %v4917_v2 }
  0x24   :  { %326 = vmatprep.mubr.bf16.mxu1 %v4917_v2  ;;  %4293 = vmatpush3.bf16.msra.mxu0 %v4734_v42 }
  0x25   :  { %4333 = vmatpush3.bf16.msra.mxu1 %v4735_v43  ;;  %4294 = vmatprep.subr.bf16.mxu0 %v4736_v44 }
  0x26   :  { %4334 = vmatprep.subr.bf16.mxu1 %v4737_v45 }
  0x2a   :  { %3766 = vmatmul.mubr.msk.bf16.gmra.mrb[12].mxu0 %vm165_vm1, %v4715_v46 }
  0x2b   :  { %3771 = vmatmul.mubr.msk.bf16.gmra.mrb[12].mxu1 %vm165_vm1, %v4715_v46 }
  0x2c   :  { %11 = vsyncpa [#allocation3], 0  ;;  %v4738_v47 = vld [vmem:[%s6034_s2 + $0x28] sm:$0xff]   ;;  %v4740_v49 = vld [vmem:[%s6034_s2 + $0x70] sm:$0xff]   ;;  %v55_v57 = vlaneseq  ;;  %vm4919_vm2 = vmmov 0   ;;  %vm779_vm3 = vcmask 523264  }
  0x2d   :  { %v4739_v48 = vld [vmem:[%s6034_s2 + $0xa8] sm:$0xff]   ;;  %4295 = vmatpush3.bf16.msra.mxu0 %v4738_v47  ;;  %v4741_v50 = vld [vmem:[%s6034_s2 + $0xf0] sm:$0xff]   ;;  %v4744_v53 = vld [vmem:[%s6034_s2 + $0x78] sm:$0xff]   ;;  %s4921_s19 = smov [#allocation2]  }
  0x2e   :  { %4335 = vmatpush3.bf16.msra.mxu1 %v4739_v48  ;;  %v4742_v51 = vld [vmem:[%s6034_s2 + $0x30] sm:$0xff]   ;;  %4296 = vmatprep.subr.bf16.mxu0 %v4740_v49  ;;  %v4745_v54 = vld [vmem:[%s6034_s2 + $0xf8] sm:$0xff]   ;;  %v5128_v58 = vshrl.u32 %v55_v57, 7  ;;  %s3732_s20 = sshll.u32 %s4921_s19, 4  ;;  %s3733_s20 = int_to_ptr.vmem [resolvable:$true] %s3732_s20 }
  0x2f   :  { %v4743_v52 = vld [vmem:[%s6034_s2 + $0xb0] sm:$0xff]   ;;  %4336 = vmatprep.subr.bf16.mxu1 %v4741_v50  ;;  %v4746_v55 = vld [vmem:[%s6034_s2 + $0x38] sm:$0xff]   ;;  %s4893_s21 = scalar_lea.vmem %s3733_s20, 128  ;;  %p4898_p1 = scmp.lt.s32.totalorder %s3733_s20, %s3733_s20 }
  0x30   :  { %v4747_v56 = vld [vmem:[%s6034_s2 + $0xb8] sm:$0xff]   ;;  %v5131_v59 = vsub.s32 0, %v5128_v58  ;;  %v5134_v60 = vsub.s32 2, %v5128_v58  ;;  %v5140_v62 = vsub.s32 1, %v5128_v58  ;;  %v5143_v63 = vsub.s32 3, %v5128_v58  ;;  %p4894_p0 = scmp.ne.s32.totalorder %s3733_s20, %s4893_s21  ;;  %p4899_p2 = scmp.lt.s32.totalorder %s4893_s21, %s4893_s21 }
  0x31   :  { %4297 = vmatpush3.bf16.msra.mxu0 %v4742_v51  ;;  %v30_v61 = vld [vmem:[%s6036_s4] ss:$8 sm:$0xf] }
  0x32   :  { %4337 = vmatpush3.bf16.msra.mxu1 %v4743_v52  ;;  %4298 = vmatprep.subr.bf16.mxu0 %v4744_v53  ;;  %v5146_v0 = vrot.slane %v30_v61, %v5131_v59  ;;  %v5149_v1 = vrot.slane %v30_v61, %v5134_v60  ;;  %v5152_v3 = vrot.slane %v30_v61, %v5140_v62  ;;  %p4900_p3 = por %p4899_p2, %p4898_p1 }
  0x33   :  { %4338 = vmatprep.subr.bf16.mxu1 %v4745_v54  ;;  %v5155_v4 = vrot.slane %v30_v61, %v5143_v63 }
  0x34   :  { %p4901_p4 = pnand %p4900_p3, %p4894_p0 }
  0x35   :  { %4299 = vmatpush3.bf16.msra.mxu0 %v4746_v55 }
  0x36   :  { %4339 = vmatpush3.bf16.msra.mxu1 %v4747_v56 }
  0xe5   :  { %v225_v5 = vpop.f32.mrb[0].mxu0 }
  0xe6   :  { %v298_v6 = vpop.f32.mrb[0].mxu1  ;;  %v226_v7 = vadd.f32 %v225_v5, %v5146_v0  ;;  %v227_v9 = vpop.f32.mrb[1].mxu0 }
  0xe7   :  { %v299_v8 = vadd.f32 %v298_v6, %v5149_v1  ;;  %v300_v10 = vpop.f32.mrb[1].mxu1  ;;  %v228_v11 = vadd.f32 %v227_v9, %v5152_v3  ;;  %v229_v13 = vpop.f32.mrb[2].mxu0 }
  0xe8   :  { %v301_v12 = vadd.f32 %v300_v10, %v5155_v4  ;;  %v302_v14 = vpop.f32.mrb[2].mxu1  ;;  %v230_v16 = vadd.f32 %v229_v13, %v5146_v0  ;;  %v231_v18 = vpop.f32.mrb[3].mxu0  ;;  %v337_v23 = vmax.f32 %v226_v7, 0.0 }
  0xe9   :  { %v339_v15 = vmax.f32 %v299_v8, 0.0  ;;  %v303_v17 = vadd.f32 %v302_v14, %v5149_v1  ;;  %v304_v19 = vpop.f32.mrb[3].mxu1  ;;  %v232_v21 = vadd.f32 %v231_v18, %v5152_v3  ;;  %v338_v26 = vmax.f32 %v228_v11, 0.0 }
  0xea   :  { %v340_v20 = vmax.f32 %v301_v12, 0.0  ;;  %v305_v22 = vadd.f32 %v304_v19, %v5155_v4  ;;  %v341_v24 = vmax.f32 %v230_v16, 0.0 }
  0xeb   :  { %v343_v25 = vmax.f32 %v303_v17, 0.0  ;;  %v342_v27 = vmax.f32 %v232_v21, 0.0 }
  0xec   :  { %v344_v28 = vmax.f32 %v305_v22, 0.0  ;;  %v369_v29 = vpack.c.bf16 %v341_v24, %v337_v23 }
  0xed   :  { %v371_v30 = vpack.c.bf16 %v343_v25, %v339_v15  ;;  %v370_v31 = vpack.c.bf16 %v342_v27, %v338_v26  ;;  %v235_v33 = vpop.f32.mrb[4].mxu0 }
  0xee   :  { %v372_v32 = vpack.c.bf16 %v344_v28, %v340_v20  ;;  %v308_v34 = vpop.f32.mrb[4].mxu1  ;;  %v236_v35 = vadd.f32 %v235_v33, %v5146_v0  ;;  %v237_v37 = vpop.f32.mrb[5].mxu0 }
  0xef   :  { %v309_v36 = vadd.f32 %v308_v34, %v5149_v1  ;;  %v310_v38 = vpop.f32.mrb[5].mxu1  ;;  %v238_v39 = vadd.f32 %v237_v37, %v5152_v3  ;;  %v239_v41 = vpop.f32.mrb[6].mxu0  ;;  %673 = vmatprep.mubr.bf16.mxu0 %v370_v31 }
  0xf0   :  { %v311_v40 = vadd.f32 %v310_v38, %v5155_v4  ;;  %v312_v42 = vpop.f32.mrb[6].mxu1  ;;  %738 = vmatprep.mubr.bf16.mxu1 %v372_v32  ;;  %v240_v44 = vadd.f32 %v239_v41, %v5146_v0  ;;  %v241_v46 = vpop.f32.mrb[7].mxu0  ;;  %674 = vmatmul.mubr.bf16.vlgmr.msra.gmra.mrb[16].mxu0 %v369_v29  ;;  %v345_v51 = vmax.f32 %v236_v35, 0.0 }
  0xf1   :  { %v347_v43 = vmax.f32 %v309_v36, 0.0  ;;  %v313_v45 = vadd.f32 %v312_v42, %v5149_v1  ;;  %v314_v47 = vpop.f32.mrb[7].mxu1  ;;  %739 = vmatmul.mubr.bf16.vlgmr.msra.gmra.mrb[16].mxu1 %v371_v30  ;;  %v242_v49 = vadd.f32 %v241_v46, %v5152_v3  ;;  %v346_v54 = vmax.f32 %v238_v39, 0.0 }
  0xf2   :  { %v348_v48 = vmax.f32 %v311_v40, 0.0  ;;  %v315_v50 = vadd.f32 %v314_v47, %v5155_v4  ;;  %v349_v52 = vmax.f32 %v240_v44, 0.0 }
  0xf3   :  { %v351_v53 = vmax.f32 %v313_v45, 0.0  ;;  %v350_v55 = vmax.f32 %v242_v49, 0.0 }
  0xf4   :  { %v352_v56 = vmax.f32 %v315_v50, 0.0  ;;  %v373_v57 = vpack.c.bf16 %v349_v52, %v345_v51 }
  0xf5   :  { %v375_v61 = vpack.c.bf16 %v351_v53, %v347_v43  ;;  %v374_v5 = vpack.c.bf16 %v350_v55, %v346_v54  ;;  %v245_v7 = vpop.f32.mrb[8].mxu0 }
  0xf6   :  { %v376_v6 = vpack.c.bf16 %v352_v56, %v348_v48  ;;  %v318_v8 = vpop.f32.mrb[8].mxu1  ;;  %v246_v9 = vadd.f32 %v245_v7, %v5146_v0  ;;  %v247_v11 = vpop.f32.mrb[9].mxu0 }
  0xf7   :  { %v319_v10 = vadd.f32 %v318_v8, %v5149_v1  ;;  %v320_v12 = vpop.f32.mrb[9].mxu1  ;;  %v248_v13 = vadd.f32 %v247_v11, %v5152_v3  ;;  %v249_v15 = vpop.f32.mrb[10].mxu0  ;;  %681 = vmatprep.mubr.bf16.mxu0 %v374_v5  ;;  %v858_v8 = vld [vmem:[%s6035_s3 + $0x20] sm:$0xff] }
  0xf8   :  { %v321_v14 = vadd.f32 %v320_v12, %v5155_v4  ;;  %v322_v16 = vpop.f32.mrb[10].mxu1  ;;  %746 = vmatprep.mubr.bf16.mxu1 %v376_v6  ;;  %v250_v18 = vadd.f32 %v249_v15, %v5146_v0  ;;  %v251_v20 = vpop.f32.mrb[11].mxu0  ;;  %682 = vmatmul.mubr.bf16.gmra.mrb[20].mxu0 %v373_v57  ;;  %v353_v25 = vmax.f32 %v246_v9, 0.0  ;;  %v862_v9 = vld [vmem:[%s6035_s3 + $0x40] sm:$0xff] }
  0xf9   :  { %v355_v17 = vmax.f32 %v319_v10, 0.0  ;;  %v323_v19 = vadd.f32 %v322_v16, %v5149_v1  ;;  %v324_v21 = vpop.f32.mrb[11].mxu1  ;;  %747 = vmatmul.mubr.bf16.gmra.mrb[20].mxu1 %v375_v61  ;;  %v252_v23 = vadd.f32 %v251_v20, %v5152_v3  ;;  %v354_v28 = vmax.f32 %v248_v13, 0.0  ;;  %v866_v12 = vld [vmem:[%s6035_s3 + $0x60] sm:$0xff] }
  0xfa   :  { %v356_v22 = vmax.f32 %v321_v14, 0.0  ;;  %v325_v24 = vadd.f32 %v324_v21, %v5155_v4  ;;  %v357_v26 = vmax.f32 %v250_v18, 0.0  ;;  %v3814_v13 = vcombine.high %v862_v9, %v866_v12  ;;  %v870_v14 = vld [vmem:[%s6035_s3 + $0x80] sm:$0xff] }
  0xfb   :  { %v359_v27 = vmax.f32 %v323_v19, 0.0  ;;  %v358_v29 = vmax.f32 %v252_v23, 0.0  ;;  %v874_v15 = vld [vmem:[%s6035_s3 + $0xa0] sm:$0xff]  ;;  %v3813_v16 = vcombine.low %v862_v9, %v866_v12 }
  0xfc   :  { %v360_v30 = vmax.f32 %v325_v24, 0.0  ;;  %v377_v31 = vpack.c.bf16 %v357_v26, %v353_v25  ;;  %v3821_v18 = vcombine.low %v870_v14, %v874_v15  ;;  %v878_v19 = vld [vmem:[%s6035_s3 + $0xc0] sm:$0x11] }
  0xfd   :  { %v379_v32 = vpack.c.bf16 %v359_v27, %v355_v17  ;;  %v378_v33 = vpack.c.bf16 %v358_v29, %v354_v28  ;;  %v255_v35 = vpop.f32.mrb[12].mxu0  ;;  %v3822_v17 = vcombine.high %v870_v14, %v874_v15  ;;  %v3830_v20 = vcombine.high %v878_v19, %v878_v19  ;;  %v5219_v25 = vld [vmem:[%s6036_s4 + $0x20] ss:$0 sm:$0xff] }
  0xfe   :  { %v380_v34 = vpack.c.bf16 %v360_v30, %v356_v22  ;;  %v328_v36 = vpop.f32.mrb[12].mxu1  ;;  %v256_v37 = vadd.f32 %v255_v35, %v5146_v0  ;;  %v257_v39 = vpop.f32.mrb[13].mxu0  ;;  %v3829_v21 = vcombine.low %v878_v19, %v878_v19 }
  0xff   :  { %v329_v38 = vadd.f32 %v328_v36, %v5149_v1  ;;  %v330_v40 = vpop.f32.mrb[13].mxu1  ;;  %v258_v41 = vadd.f32 %v257_v39, %v5152_v3  ;;  %v259_v43 = vpop.f32.mrb[14].mxu0  ;;  %689 = vmatprep.mubr.bf16.mxu0 %v378_v33 }
 0x100   :  { %v331_v42 = vadd.f32 %v330_v40, %v5155_v4  ;;  %v332_v44 = vpop.f32.mrb[14].mxu1  ;;  %754 = vmatprep.mubr.bf16.mxu1 %v380_v34  ;;  %v260_v46 = vadd.f32 %v259_v43, %v5146_v0  ;;  %v261_v48 = vpop.f32.mrb[15].mxu0  ;;  %690 = vmatmul.mubr.bf16.gmra.mrb[24].mxu0 %v377_v31  ;;  %v361_v53 = vmax.f32 %v256_v37, 0.0  ;;  %v1026_v22 = vsel %vm178_vm0, %v3829_v21, 0 }
 0x101   :  { %v363_v45 = vmax.f32 %v329_v38, 0.0  ;;  %v333_v47 = vadd.f32 %v332_v44, %v5149_v1  ;;  %v334_v49 = vpop.f32.mrb[15].mxu1  ;;  %755 = vmatmul.mubr.bf16.gmra.mrb[24].mxu1 %v379_v32  ;;  %v262_v51 = vadd.f32 %v261_v48, %v5152_v3  ;;  %v362_v56 = vmax.f32 %v258_v41, 0.0 }
 0x102   :  { %v364_v50 = vmax.f32 %v331_v42, 0.0  ;;  %v335_v52 = vadd.f32 %v334_v49, %v5155_v4  ;;  %v365_v54 = vmax.f32 %v260_v46, 0.0  ;;  %v4918_v1 = vmov 0.0|0.0   ;;  %v854_v4 = vld [vmem:[%s6035_s3] sm:$0xff] }
 0x103   :  { %v367_v55 = vmax.f32 %v333_v47, 0.0  ;;  %v366_v57 = vmax.f32 %v262_v51, 0.0  ;;  %4608 = vmatprep.subr.bf16.mxu0 %v4918_v1  ;;  %v4920_v3 = vmov 0.0   ;;  %v3805_v10 = vcombine.low %v854_v4, %v858_v8 }
 0x104   :  { %v368_v61 = vmax.f32 %v335_v52, 0.0  ;;  %v381_v5 = vpack.c.bf16 %v365_v54, %v361_v53  ;;  %v3806_v11 = vcombine.high %v854_v4, %v858_v8 }
 0x105   :  { %v383_v6 = vpack.c.bf16 %v367_v55, %v363_v45  ;;  %v382_v0 = vpack.c.bf16 %v366_v57, %v362_v56 }
 0x106   :  { %v384_v7 = vpack.c.bf16 %v368_v61, %v364_v50  ;;  %1049 = vmatprep.subr.bf16.mxu1 %v3806_v11 }
 0x107   :  { %697 = vmatprep.mubr.bf16.mxu0 %v382_v0  ;;  %1050 = vmatpush1.bf16.msra.mxu1 %v3805_v10 }
 0x108   :  { %762 = vmatprep.mubr.bf16.mxu1 %v384_v7  ;;  %698 = vmatmul.mubr.bf16.gmra.mrb[28].mxu0 %v381_v5 }
 0x109   :  { %763 = vmatmul.mubr.bf16.gmra.mrb[28].mxu1 %v383_v6  ;;  %4567 = vmatprep.mubr.msk.f32.mxu0 %vm4919_vm2, %v4920_v3 }
 0x10a   :  { %1081 = vmatprep.mubr.bf16.mxu1 %v4917_v2  ;;  %1051 = vmatprep.subr.bf16.mxu1 %v3814_v13 }
 0x10b   :  { %1052 = vmatpush1.bf16.msra.mxu1 %v3813_v16 }
 0x10c   :  { %1053 = vmatprep.subr.bf16.mxu1 %v3822_v17 }
 0x10f   :  { %1054 = vmatpush1.bf16.msra.mxu1 %v3821_v18 }
 0x110   :  { %3837 = vmatprep.subr.msk.bf16.mxu1 %vm178_vm0, %v3830_v20 }
 0x113   :  { %1056 = vmatpush1.bf16.msra.mxu1 %v1026_v22 }
 0x1c3   :  { %v4300_v23 = vpop.f32.mrb[16].mxu0 }
 0x1c4   :  { %v4340_v24 = vpop.f32.mrb[16].mxu1  ;;  %v4301_v26 = vpop.f32.mrb[17].mxu0 }
 0x1c5   :  { %v4341_v27 = vpop.f32.mrb[17].mxu1  ;;  %v4302_v28 = vadd.f32 %v4301_v26, %v4300_v23  ;;  %v4303_v30 = vpop.f32.mrb[18].mxu0 }
 0x1c6   :  { %v4342_v29 = vadd.f32 %v4341_v27, %v4340_v24  ;;  %v4343_v31 = vpop.f32.mrb[18].mxu1  ;;  %v4304_v32 = vpop.f32.mrb[19].mxu0 }
 0x1c7   :  { %v4344_v33 = vpop.f32.mrb[19].mxu1  ;;  %v676_v34 = vadd.f32 %v4302_v28, %v5219_v25  ;;  %v4305_v35 = vadd.f32 %v4304_v32, %v4303_v30 }
 0x1c8   :  { %v4345_v36 = vadd.f32 %v4344_v33, %v4343_v31 }
 0x1c9   :  { %v741_v37 = vadd.f32 %v4342_v29, %v676_v34  ;;  %v679_v38 = vadd.f32 %v4305_v35, %v5219_v25 }
 0x1cb   :  { %v744_v39 = vadd.f32 %v4345_v36, %v679_v38  ;;  %v4306_v40 = vpop.f32.mrb[20].mxu0  ;;  %v771_v44 = vmax.f32 %v741_v37, 0.0 }
 0x1cc   :  { %v4346_v41 = vpop.f32.mrb[20].mxu1  ;;  %v4307_v42 = vpop.f32.mrb[21].mxu0 }
 0x1cd   :  { %v4347_v43 = vpop.f32.mrb[21].mxu1  ;;  %v772_v45 = vmax.f32 %v744_v39, 0.0  ;;  %v4308_v46 = vadd.f32 %v4307_v42, %v4306_v40  ;;  %v4309_v48 = vpop.f32.mrb[22].mxu0  ;;  %v855_v42 = vld [vmem:[%s6035_s3 + $0x8] sm:$0xff] }
 0x1ce   :  { %v4348_v47 = vadd.f32 %v4347_v43, %v4346_v41  ;;  %v4349_v49 = vpop.f32.mrb[22].mxu1  ;;  %v4310_v50 = vpop.f32.mrb[23].mxu0  ;;  %v859_v43 = vld [vmem:[%s6035_s3 + $0x28] sm:$0xff] }
 0x1cf   :  { %v4350_v51 = vpop.f32.mrb[23].mxu1  ;;  %v4609_v52 = vpack.c.bf16 %v772_v45, %v771_v44  ;;  %v684_v53 = vadd.f32 %v4308_v46, %v5219_v25  ;;  %v4311_v54 = vadd.f32 %v4310_v50, %v4309_v48  ;;  %v3808_v46 = vcombine.high %v855_v42, %v859_v43  ;;  %v867_v48 = vld [vmem:[%s6035_s3 + $0x68] sm:$0xff] }
 0x1d0   :  { %v4351_v55 = vadd.f32 %v4350_v51, %v4349_v49  ;;  %v5247_v49 = vld [vmem:[%s6037_s5] sm:$0xff]  ;;  %v3807_v50 = vcombine.low %v855_v42, %v859_v43  ;;  %v4761_v42 = vld [vmem:[%s6033_s1 + $0x7c] ss:$16 sps:$4 sm:$0xff]  }
 0x1d1   :  { %v749_v56 = vadd.f32 %v4348_v47, %v684_v53  ;;  %v687_v57 = vadd.f32 %v4311_v54, %v5219_v25  ;;  %4610 = vmatpush3.bf16.msra.mxu0 %v4609_v52  ;;  %v871_v52 = vld [vmem:[%s6035_s3 + $0x88] sm:$0xff]  ;;  %v4756_v43 = vld [vmem:[%s6033_s1 + $0x70] ss:$16 sps:$4 sm:$0xff]  }
 0x1d2   :  { %4611 = vmatprep.subr.bf16.mxu0 %v4918_v1  ;;  %v875_v53 = vld [vmem:[%s6035_s3 + $0xa8] sm:$0xff] }
 0x1d3   :  { %v752_v61 = vadd.f32 %v4351_v55, %v687_v57  ;;  %v4312_v5 = vpop.f32.mrb[24].mxu0  ;;  %v773_v4 = vmax.f32 %v749_v56, 0.0  ;;  %v3824_v55 = vcombine.high %v871_v52, %v875_v53  ;;  %v879_v56 = vld [vmem:[%s6035_s3 + $0xc8] sm:$0x11]  ;;  %v3823_v57 = vcombine.low %v871_v52, %v875_v53  ;;  %v3867_v52 = vld [vmem:[%s6033_s1 + $0xd8] sm:$0x11] }
 0x1d4   :  { %v4352_v6 = vpop.f32.mrb[24].mxu1  ;;  %v4313_v0 = vpop.f32.mrb[25].mxu0  ;;  %v4768_v53 = vld [vmem:[%s6033_s1 + $0xb0] ss:$16 sps:$4 sm:$0xff]  }
 0x1d5   :  { %v4353_v7 = vpop.f32.mrb[25].mxu1  ;;  %v774_v8 = vmax.f32 %v752_v61, 0.0  ;;  %v4314_v9 = vadd.f32 %v4313_v0, %v4312_v5  ;;  %v4315_v11 = vpop.f32.mrb[26].mxu0  ;;  %v3832_v61 = vcombine.high %v879_v56, %v879_v56  ;;  %v3831_v5 = vcombine.low %v879_v56, %v879_v56  ;;  %v856_v0 = vld [vmem:[%s6035_s3 + $0x10] sm:$0xff] }
 0x1d6   :  { %v4354_v10 = vadd.f32 %v4353_v7, %v4352_v6  ;;  %v4355_v12 = vpop.f32.mrb[26].mxu1  ;;  %v4316_v13 = vpop.f32.mrb[27].mxu0  ;;  %v860_v7 = vld [vmem:[%s6035_s3 + $0x30] sm:$0xff]  ;;  %v3887_v56 = vcombine.high %v3867_v52, %v3867_v52 }
 0x1d7   :  { %v4356_v14 = vpop.f32.mrb[27].mxu1  ;;  %v4612_v15 = vpack.c.bf16 %v774_v8, %v773_v4  ;;  %v692_v16 = vadd.f32 %v4314_v9, %v5219_v25  ;;  %v4317_v17 = vadd.f32 %v4316_v13, %v4315_v11  ;;  %v1032_v6 = vsel %vm178_vm0, %v3831_v5, 0  ;;  %v857_v4 = vld [vmem:[%s6035_s3 + $0x18] sm:$0xff]  ;;  %v864_v13 = vld [vmem:[%s6035_s3 + $0x50] sm:$0xff] }
 0x1d8   :  { %v4357_v18 = vadd.f32 %v4356_v14, %v4355_v12  ;;  %v3810_v8 = vcombine.high %v856_v0, %v860_v7  ;;  %v861_v9 = vld [vmem:[%s6035_s3 + $0x38] sm:$0xff]  ;;  %v868_v14 = vld [vmem:[%s6035_s3 + $0x70] sm:$0xff] }
 0x1d9   :  { %v757_v19 = vadd.f32 %v4354_v10, %v692_v16  ;;  %v695_v20 = vadd.f32 %v4317_v17, %v5219_v25  ;;  %4613 = vmatpush3.bf16.msra.mxu0 %v4612_v15  ;;  %v3809_v10 = vcombine.low %v856_v0, %v860_v7  ;;  %v3811_v11 = vcombine.low %v857_v4, %v861_v9  ;;  %v865_v15 = vld [vmem:[%s6035_s3 + $0x58] sm:$0xff]  ;;  %v4782_v0 = vld [vmem:[%s6034_s2 + $0x140] sm:$0xff]  }
 0x1da   :  { %4614 = vmatprep.subr.bf16.mxu0 %v4918_v1  ;;  %v3812_v12 = vcombine.high %v857_v4, %v861_v9  ;;  %1131 = vmatprep.subr.bf16.mxu1 %v3810_v8  ;;  %v869_v16 = vld [vmem:[%s6035_s3 + $0x78] sm:$0xff]  ;;  %v4783_v7 = vld [vmem:[%s6034_s2 + $0x1c0] sm:$0xff]  }
 0x1db   :  { %v760_v21 = vadd.f32 %v4357_v18, %v695_v20  ;;  %v4318_v22 = vpop.f32.mrb[28].mxu0  ;;  %v775_v27 = vmax.f32 %v757_v19, 0.0  ;;  %v3818_v20 = vcombine.high %v864_v13, %v868_v14  ;;  %v4778_v4 = vld [vmem:[%s6032_s0 + $0x20] sm:$0xff]  }
 0x1dc   :  { %v4358_v23 = vpop.f32.mrb[28].mxu1  ;;  %v4319_v24 = vpop.f32.mrb[29].mxu0  ;;  %v4784_v8 = vld [vmem:[%s6034_s2 + $0x100] sm:$0xff]  }
 0x1dd   :  { %v4359_v26 = vpop.f32.mrb[29].mxu1  ;;  %v776_v28 = vmax.f32 %v760_v21, 0.0  ;;  %v4320_v29 = vadd.f32 %v4319_v24, %v4318_v22  ;;  %v4321_v31 = vpop.f32.mrb[30].mxu0  ;;  %v3820_v21 = vcombine.high %v865_v15, %v869_v16  ;;  %v872_v22 = vld [vmem:[%s6035_s3 + $0x90] sm:$0xff]  ;;  %v873_v24 = vld [vmem:[%s6035_s3 + $0x98] sm:$0xff]  ;;  %v4785_v9 = vld [vmem:[%s6034_s2 + $0x180] sm:$0xff]  }
 0x1de   :  { %v4360_v30 = vadd.f32 %v4359_v26, %v4358_v23  ;;  %v4361_v32 = vpop.f32.mrb[30].mxu1  ;;  %v4322_v33 = vpop.f32.mrb[31].mxu0  ;;  %v876_v23 = vld [vmem:[%s6035_s3 + $0xb0] sm:$0xff]  ;;  %v877_v26 = vld [vmem:[%s6035_s3 + $0xb8] sm:$0xff] }
 0x1df   :  { %v4362_v34 = vpop.f32.mrb[31].mxu1  ;;  %v4615_v35 = vpack.c.bf16 %v776_v28, %v775_v27  ;;  %v700_v36 = vadd.f32 %v4320_v29, %v5219_v25  ;;  %v4323_v37 = vadd.f32 %v4322_v33, %v4321_v31  ;;  %v3817_v27 = vcombine.low %v864_v13, %v868_v14  ;;  %v880_v31 = vld [vmem:[%s6035_s3 + $0xd0] sm:$0x11]  ;;  %v4789_v13 = vld [vmem:[%s6034_s2 + $0x188] sm:$0xff]  }
 0x1e0   :  { %v4363_v38 = vadd.f32 %v4362_v34, %v4361_v32  ;;  %v3819_v28 = vcombine.low %v865_v15, %v869_v16  ;;  %v3826_v29 = vcombine.high %v872_v22, %v876_v23  ;;  %v881_v32 = vld [vmem:[%s6035_s3 + $0xd8] sm:$0x11]  ;;  %v3825_v33 = vcombine.low %v872_v22, %v876_v23  ;;  %v4790_v14 = vld [vmem:[%s6034_s2 + $0x150] sm:$0xff]   ;;  %v4779_v16 = vld [vmem:[%s6032_s0 + $0x28] sm:$0xff]  }
 0x1e1   :  { %v765_v39 = vadd.f32 %v4360_v30, %v700_v36  ;;  %v703_v40 = vadd.f32 %v4323_v37, %v5219_v25  ;;  %4616 = vmatpush3.bf16.msra.mxu0 %v4615_v35  ;;  %v863_v25 = vld [vmem:[%s6035_s3 + $0x48] sm:$0xff]  ;;  %v3828_v30 = vcombine.high %v873_v24, %v877_v26  ;;  %v3827_v34 = vcombine.low %v873_v24, %v877_v26  ;;  %v4791_v15 = vld [vmem:[%s6034_s2 + $0x1d0] sm:$0xff]   ;;  %v4797_v22 = vld [vmem:[%s6034_s2 + $0x198] sm:$0xff]  }
 0x1e2   :  { %4617 = vmatprep.subr.bf16.mxu0 %v4918_v1  ;;  %v3816_v51 = vcombine.high %v863_v25, %v867_v48  ;;  %v3815_v54 = vcombine.low %v863_v25, %v867_v48  ;;  %v3834_v35 = vcombine.high %v880_v31, %v880_v31  ;;  %v3836_v36 = vcombine.high %v881_v32, %v881_v32  ;;  %v4765_v25 = vld [vmem:[%s6033_s1 + $0x98] ss:$16 sps:$4 sm:$0xff]   ;;  %v4770_v48 = vld [vmem:[%s6033_s1 + $0xb4] ss:$16 sps:$4 sm:$0xff]  }
 0x1e3   :  { %v768_v41 = vadd.f32 %v4363_v38, %v703_v40  ;;  %v777_v44 = vmax.f32 %v765_v39, 0.0  ;;  %v3833_v37 = vcombine.low %v880_v31, %v880_v31  ;;  %v3835_v38 = vcombine.low %v881_v32, %v881_v32  ;;  %v4798_v23 = vld [vmem:[%s6034_s2 + $0x160] sm:$0xff]   ;;  %v4780_v26 = vld [vmem:[%s6032_s0 + $0x30] sm:$0xff]   ;;  %v4781_v31 = vld [vmem:[%s6032_s0 + $0x38] sm:$0xff]  }
 0x1e4   :  { %v4799_v24 = vld [vmem:[%s6034_s2 + $0x1e0] sm:$0xff]   ;;  %v4804_v32 = vld [vmem:[%s6034_s2 + $0x128] sm:$0xff]  }
 0x1e5   :  { %v778_v45 = vmax.f32 %v768_v41, 0.0  ;;  %v1038_v39 = vsel %vm178_vm0, %v3833_v37, 0  ;;  %v1044_v40 = vsel %vm178_vm0, %v3835_v38, 0  ;;  %v4758_v41 = vld [vmem:[%s6033_s1 + $0x74] ss:$16 sps:$4 sm:$0xff]   ;;  %v4810_v38 = vld [vmem:[%s6034_s2 + $0x178] sm:$0xff]  }
 0x1e6   :  { %v4809_v37 = vld [vmem:[%s6034_s2 + $0x1b0] sm:$0xff]  }
 0x1e7   :  { %v4618_v47 = vpack.c.bf16 %v778_v45, %v777_v44  ;;  %v4759_v44 = vld [vmem:[%s6033_s1 + $0x78] ss:$16 sps:$4 sm:$0xff]   ;;  %v4764_v45 = vld [vmem:[%s6033_s1 + $0x94] ss:$16 sps:$4 sm:$0xff]  }
 0x1e9   :  { %4619 = vmatpush3.bf16.msra.mxu0 %v4618_v47  ;;  %v4762_v47 = vld [vmem:[%s6033_s1 + $0x90] ss:$16 sps:$4 sm:$0xff]  }
 0x1ea   :  { %1090 = vmatprep.subr.bf16.mxu0 %v3808_v46  ;;  %v4767_v46 = vld [vmem:[%s6033_s1 + $0x9c] ss:$16 sps:$4 sm:$0xff]  }
 0x1ec   :  { %4568 = vmatmul.mubr.msk.f32.vlgmr.msra.gmra.mrb[32].mxu0 %vm779_vm3, %v5247_v49 }
 0x1ed   :  { %1091 = vmatpush1.bf16.msra.mxu0 %v3807_v50  ;;  %1122 = vmatprep.mubr.bf16.mxu0 %v4917_v2  ;;  %v4773_v50 = vld [vmem:[%s6033_s1 + $0xbc] ss:$16 sps:$4 sm:$0xff]  }
 0x1ee   :  { %1092 = vmatprep.subr.bf16.mxu0 %v3816_v51  ;;  %v3866_v51 = vld [vmem:[%s6033_s1 + $0xd0] sm:$0x11] }
 0x1f1   :  { %1093 = vmatpush1.bf16.msra.mxu0 %v3815_v54  ;;  %v4771_v54 = vld [vmem:[%s6033_s1 + $0xb8] ss:$16 sps:$4 sm:$0xff]  }
 0x1f2   :  { %1094 = vmatprep.subr.bf16.mxu0 %v3824_v55  ;;  %v3885_v55 = vcombine.high %v3866_v51, %v3866_v51 }
 0x1f5   :  { %1095 = vmatpush1.bf16.msra.mxu0 %v3823_v57  ;;  %v3884_v57 = vcombine.low %v3866_v51, %v3866_v51 }
 0x1f6   :  { %3839 = vmatprep.subr.msk.bf16.mxu0 %vm178_vm0, %v3832_v61  ;;  %v3886_v61 = vcombine.low %v3867_v52, %v3867_v52 }
 0x1f7   :  { %v1413_v5 = vsel %vm178_vm0, %v3884_v57, 0 }
 0x1f9   :  { %1097 = vmatpush1.bf16.msra.mxu0 %v1032_v6  ;;  %v1419_v6 = vsel %vm178_vm0, %v3886_v61, 0 }
 0x1fa   :  { %1172 = vmatprep.subr.bf16.mxu0 %v3812_v12  ;;  %v4788_v12 = vld [vmem:[%s6034_s2 + $0x108] sm:$0xff]  }
 0x2bf   :  { %v849_v17 = vpop.f32.mrb[32].mxu0 }
 0x2c0   :  { %v853_v18 = vpack.c.bf16 %v849_v17, %v849_v17  ;;  %v4569_v19 = vpop.f32.mrb[33].mxu0  ;;  %v4792_v17 = vld [vmem:[%s6034_s2 + $0x110] sm:$0xff]  }
 0x2c1   :  { %v4794_v19 = vld [vmem:[%s6034_s2 + $0x158] sm:$0xff]  }
 0x2c2   :  { %3838 = vmatmul.mubr.msk.bf16.vlgmr.msra.gmra.mrb[32].mxu1 %vm165_vm1, %v853_v18  ;;  %3840 = vmatmul.mubr.msk.bf16.vlgmr.msra.gmra.mrb[36].mxu0 %vm165_vm1, %v853_v18 }
 0x2c3   :  { %1132 = vmatpush1.bf16.msra.mxu1 %v3809_v10  ;;  %1173 = vmatpush1.bf16.msra.mxu0 %v3811_v11  ;;  %v4786_v10 = vld [vmem:[%s6034_s2 + $0x148] sm:$0xff]  }
 0x2c4   :  { %1133 = vmatprep.subr.bf16.mxu1 %v3818_v20  ;;  %1174 = vmatprep.subr.bf16.mxu0 %v3820_v21  ;;  %v4787_v11 = vld [vmem:[%s6034_s2 + $0x1c8] sm:$0xff]   ;;  %v4795_v20 = vld [vmem:[%s6034_s2 + $0x1d8] sm:$0xff]  }
 0x2c5   :  { %1163 = vmatprep.mubr.bf16.mxu1 %v4917_v2  ;;  %1204 = vmatprep.mubr.bf16.mxu0 %v4917_v2  ;;  %v4796_v21 = vld [vmem:[%s6034_s2 + $0x118] sm:$0xff]  }
 0x2c7   :  { %1134 = vmatpush1.bf16.msra.mxu1 %v3817_v27  ;;  %1175 = vmatpush1.bf16.msra.mxu0 %v3819_v28  ;;  %v4800_v27 = vld [vmem:[%s6034_s2 + $0x120] sm:$0xff]  }
 0x2c8   :  { %1135 = vmatprep.subr.bf16.mxu1 %v3826_v29  ;;  %1176 = vmatprep.subr.bf16.mxu0 %v3828_v30  ;;  %v4801_v28 = vld [vmem:[%s6034_s2 + $0x1a0] sm:$0xff]   ;;  %v4802_v29 = vld [vmem:[%s6034_s2 + $0x168] sm:$0xff]  }
 0x2c9   :  { %v4803_v30 = vld [vmem:[%s6034_s2 + $0x1e8] sm:$0xff]  }
 0x2cb   :  { %1136 = vmatpush1.bf16.msra.mxu1 %v3825_v33  ;;  %1177 = vmatpush1.bf16.msra.mxu0 %v3827_v34  ;;  %v4805_v33 = vld [vmem:[%s6034_s2 + $0x1a8] sm:$0xff]   ;;  %v4806_v34 = vld [vmem:[%s6034_s2 + $0x170] sm:$0xff]  }
 0x2cc   :  { %3841 = vmatprep.subr.msk.bf16.mxu1 %vm178_vm0, %v3834_v35  ;;  %3843 = vmatprep.subr.msk.bf16.mxu0 %vm178_vm0, %v3836_v36  ;;  %v4807_v35 = vld [vmem:[%s6034_s2 + $0x1f0] sm:$0xff]  }
 0x2cd   :  { %v4808_v36 = vld [vmem:[%s6034_s2 + $0x130] sm:$0xff]  }
 0x2cf   :  { %1138 = vmatpush1.bf16.msra.mxu1 %v1038_v39  ;;  %1179 = vmatpush1.bf16.msra.mxu0 %v1044_v40  ;;  %v4811_v39 = vld [vmem:[%s6034_s2 + $0x1f8] sm:$0xff]  }
 0x2d0   :  { %1424 = vmatprep.subr.bf16.mxu1 %v4758_v41  ;;  %1497 = vmatprep.subr.bf16.mxu0 %v4761_v42  ;;  %v4812_v40 = vld [vmem:[%s6034_s2 + $0x138] sm:$0xff]  }
 0x2d1   :  { %v4813_v41 = vld [vmem:[%s6034_s2 + $0x1b8] sm:$0xff]  }
 0x2d2   :  { %3842 = vmatmul.mubr.msk.bf16.vlgmr.msra.gmra.mrb[36].mxu1 %vm165_vm1, %v853_v18  ;;  %3844 = vmatmul.mubr.msk.bf16.vlgmr.msra.gmra.mrb[40].mxu0 %vm165_vm1, %v853_v18  ;;  %v4793_v18 = vld [vmem:[%s6034_s2 + $0x190] sm:$0xff]  }
 0x2d3   :  { %1425 = vmatpush1.bf16.msra.mxu1 %v4756_v43  ;;  %1498 = vmatpush1.bf16.msra.mxu0 %v4759_v44  ;;  %v3845_v42 = vld [vmem:[%s6036_s4 + $0x1] ss:$8 sm:$0xf] }
 0x2d4   :  { %1426 = vmatprep.subr.bf16.mxu1 %v4764_v45  ;;  %1499 = vmatprep.subr.bf16.mxu0 %v4767_v46  ;;  %v5490_v43 = vrot.slane %v3845_v42, %v5131_v59  ;;  %v5493_v44 = vrot.slane %v3845_v42, %v5134_v60  ;;  %v5496_v45 = vrot.slane %v3845_v42, %v5140_v62 }
 0x2d5   :  { %1456 = vmatprep.mubr.bf16.mxu1 %v4917_v2  ;;  %1529 = vmatprep.mubr.bf16.mxu0 %v4917_v2  ;;  %v5499_v46 = vrot.slane %v3845_v42, %v5143_v63 }
 0x2d7   :  { %1427 = vmatpush1.bf16.msra.mxu1 %v4762_v47  ;;  %1500 = vmatpush1.bf16.msra.mxu0 %v4765_v25 }
 0x2d8   :  { %1428 = vmatprep.subr.bf16.mxu1 %v4770_v48  ;;  %1501 = vmatprep.subr.bf16.mxu0 %v4773_v50 }
 0x2db   :  { %1429 = vmatpush1.bf16.msra.mxu1 %v4768_v53  ;;  %1502 = vmatpush1.bf16.msra.mxu0 %v4771_v54 }
 0x2dc   :  { %3888 = vmatprep.subr.msk.bf16.mxu1 %vm178_vm0, %v3885_v55  ;;  %3893 = vmatprep.subr.msk.bf16.mxu0 %vm178_vm0, %v3887_v56 }
 0x2df   :  { %1431 = vmatpush1.bf16.msra.mxu1 %v1413_v5  ;;  %1504 = vmatpush1.bf16.msra.mxu0 %v1419_v6 }
 0x2e0   :  { %4373 = vmatprep.subr.bf16.mxu1 %v4782_v0  ;;  %4413 = vmatprep.subr.bf16.mxu0 %v4783_v7 }
 0x2e2   :  { %3889 = vmatmul.mubr.msk.bf16.vlgmr.msra.gmra.mrb[40].mxu1 %vm165_vm1, %v4778_v4  ;;  %3894 = vmatmul.mubr.msk.bf16.vlgmr.msra.gmra.mrb[44].mxu0 %vm165_vm1, %v4778_v4 }
 0x2e3   :  { %1466 = vmatprep.mubr.bf16.mxu1 %v4917_v2  ;;  %1539 = vmatprep.mubr.bf16.mxu0 %v4917_v2 }
 0x2e4   :  { %4374 = vmatpush3.bf16.msra.mxu1 %v4784_v8  ;;  %4414 = vmatpush3.bf16.msra.mxu0 %v4785_v9 }
 0x2e5   :  { %4375 = vmatprep.subr.bf16.mxu1 %v4786_v10  ;;  %4415 = vmatprep.subr.bf16.mxu0 %v4787_v11 }
 0x2e8   :  { %4376 = vmatpush3.bf16.msra.mxu1 %v4788_v12  ;;  %4416 = vmatpush3.bf16.msra.mxu0 %v4789_v13 }
 0x2e9   :  { %4377 = vmatprep.subr.bf16.mxu1 %v4790_v14  ;;  %4417 = vmatprep.subr.bf16.mxu0 %v4791_v15 }
 0x2ea   :  { %3890 = vmatmul.mubr.msk.bf16.gmra.mrb[44].mxu1 %vm165_vm1, %v4779_v16  ;;  %3895 = vmatmul.mubr.msk.bf16.gmra.mrb[48].mxu0 %vm165_vm1, %v4779_v16 }
 0x2eb   :  { %1476 = vmatprep.mubr.bf16.mxu1 %v4917_v2  ;;  %1549 = vmatprep.mubr.bf16.mxu0 %v4917_v2 }
 0x2ec   :  { %4378 = vmatpush3.bf16.msra.mxu1 %v4792_v17  ;;  %4418 = vmatpush3.bf16.msra.mxu0 %v4793_v18 }
 0x2ed   :  { %4379 = vmatprep.subr.bf16.mxu1 %v4794_v19  ;;  %4419 = vmatprep.subr.bf16.mxu0 %v4795_v20 }
 0x2f0   :  { %4380 = vmatpush3.bf16.msra.mxu1 %v4796_v21  ;;  %4420 = vmatpush3.bf16.msra.mxu0 %v4797_v22 }
 0x2f1   :  { %4381 = vmatprep.subr.bf16.mxu1 %v4798_v23  ;;  %4421 = vmatprep.subr.bf16.mxu0 %v4799_v24 }
 0x2f2   :  { %3891 = vmatmul.mubr.msk.bf16.gmra.mrb[48].mxu1 %vm165_vm1, %v4780_v26  ;;  %3896 = vmatmul.mubr.msk.bf16.gmra.mrb[52].mxu0 %vm165_vm1, %v4780_v26 }
 0x2f3   :  { %1486 = vmatprep.mubr.bf16.mxu1 %v4917_v2  ;;  %1559 = vmatprep.mubr.bf16.mxu0 %v4917_v2 }
 0x2f4   :  { %4382 = vmatpush3.bf16.msra.mxu1 %v4800_v27  ;;  %4422 = vmatpush3.bf16.msra.mxu0 %v4801_v28 }
 0x2f5   :  { %4383 = vmatprep.subr.bf16.mxu1 %v4802_v29  ;;  %4423 = vmatprep.subr.bf16.mxu0 %v4803_v30 }
 0x2f8   :  { %4384 = vmatpush3.bf16.msra.mxu1 %v4804_v32  ;;  %4424 = vmatpush3.bf16.msra.mxu0 %v4805_v33 }
 0x2f9   :  { %4385 = vmatprep.subr.bf16.mxu1 %v4806_v34  ;;  %4425 = vmatprep.subr.bf16.mxu0 %v4807_v35 }
 0x2fa   :  { %3892 = vmatmul.mubr.msk.bf16.gmra.mrb[52].mxu1 %vm165_vm1, %v4781_v31  ;;  %3897 = vmatmul.mubr.msk.bf16.gmra.mrb[56].mxu0 %vm165_vm1, %v4781_v31 }
 0x2fc   :  { %4386 = vmatpush3.bf16.msra.mxu1 %v4808_v36  ;;  %4426 = vmatpush3.bf16.msra.mxu0 %v4809_v37 }
 0x2fd   :  { %4387 = vmatprep.subr.bf16.mxu1 %v4810_v38  ;;  %4427 = vmatprep.subr.bf16.mxu0 %v4811_v39 }
 0x300   :  { %4388 = vmatpush3.bf16.msra.mxu1 %v4812_v40  ;;  %4428 = vmatpush3.bf16.msra.mxu0 %v4813_v41 }
 0x301   :  { %4620 = vmatprep.subr.bf16.mxu1 %v4918_v1 }
 0x3b5   :  { %v1458_v47 = vpop.f32.mrb[40].mxu1  ;;  %v1531_v25 = vpop.f32.mrb[44].mxu0 }
 0x3b6   :  { %v1459_v48 = vadd.f32 %v1458_v47, %v5490_v43  ;;  %v1532_v50 = vadd.f32 %v1531_v25, %v5493_v44  ;;  %v1460_v51 = vpop.f32.mrb[41].mxu1  ;;  %v1533_v52 = vpop.f32.mrb[45].mxu0 }
 0x3b7   :  { %v1461_v53 = vadd.f32 %v1460_v51, %v5496_v45  ;;  %v1534_v54 = vadd.f32 %v1533_v52, %v5499_v46  ;;  %v1462_v55 = vpop.f32.mrb[42].mxu1  ;;  %v1535_v56 = vpop.f32.mrb[46].mxu0 }
 0x3b8   :  { %v1572_v57 = vmax.f32 %v1532_v50, 0.0  ;;  %v1463_v61 = vadd.f32 %v1462_v55, %v5490_v43  ;;  %v1536_v5 = vadd.f32 %v1535_v56, %v5493_v44  ;;  %v1464_v6 = vpop.f32.mrb[43].mxu1  ;;  %v1537_v0 = vpop.f32.mrb[47].mxu0  ;;  %v1570_v9 = vmax.f32 %v1459_v48, 0.0 }
 0x3b9   :  { %v1573_v7 = vmax.f32 %v1534_v54, 0.0  ;;  %v1465_v4 = vadd.f32 %v1464_v6, %v5496_v45  ;;  %v1538_v8 = vadd.f32 %v1537_v0, %v5499_v46  ;;  %v1571_v12 = vmax.f32 %v1461_v53, 0.0 }
 0x3ba   :  { %v1574_v10 = vmax.f32 %v1463_v61, 0.0  ;;  %v1576_v11 = vmax.f32 %v1536_v5, 0.0 }
 0x3bb   :  { %v1575_v13 = vmax.f32 %v1465_v4, 0.0  ;;  %v1577_v14 = vmax.f32 %v1538_v8, 0.0 }
 0x3bc   :  { %v1602_v15 = vpack.c.bf16 %v1574_v10, %v1570_v9  ;;  %v1604_v16 = vpack.c.bf16 %v1576_v11, %v1572_v57 }
 0x3bd   :  { %v1603_v17 = vpack.c.bf16 %v1575_v13, %v1571_v12  ;;  %v1605_v18 = vpack.c.bf16 %v1577_v14, %v1573_v7  ;;  %v1468_v19 = vpop.f32.mrb[44].mxu1  ;;  %v1541_v20 = vpop.f32.mrb[48].mxu0 }
 0x3be   :  { %v1469_v21 = vadd.f32 %v1468_v19, %v5490_v43  ;;  %v1542_v22 = vadd.f32 %v1541_v20, %v5493_v44  ;;  %v1470_v23 = vpop.f32.mrb[45].mxu1  ;;  %v1543_v24 = vpop.f32.mrb[49].mxu0 }
 0x3bf   :  { %v1471_v26 = vadd.f32 %v1470_v23, %v5496_v45  ;;  %v1544_v27 = vadd.f32 %v1543_v24, %v5499_v46  ;;  %v1472_v28 = vpop.f32.mrb[46].mxu1  ;;  %v1545_v29 = vpop.f32.mrb[50].mxu0  ;;  %1907 = vmatprep.mubr.bf16.mxu1 %v1603_v17  ;;  %1972 = vmatprep.mubr.bf16.mxu0 %v1605_v18 }
 0x3c0   :  { %v1580_v30 = vmax.f32 %v1542_v22, 0.0  ;;  %v1473_v31 = vadd.f32 %v1472_v28, %v5490_v43  ;;  %v1546_v32 = vadd.f32 %v1545_v29, %v5493_v44  ;;  %v1474_v33 = vpop.f32.mrb[47].mxu1  ;;  %v1547_v34 = vpop.f32.mrb[51].mxu0  ;;  %1908 = vmatmul.mubr.bf16.vlgmr.msra.gmra.mrb[56].mxu1 %v1602_v15  ;;  %1973 = vmatmul.mubr.bf16.vlgmr.msra.gmra.mrb[60].mxu0 %v1604_v16  ;;  %v1578_v38 = vmax.f32 %v1469_v21, 0.0 }
 0x3c1   :  { %v1581_v35 = vmax.f32 %v1544_v27, 0.0  ;;  %v1475_v36 = vadd.f32 %v1474_v33, %v5496_v45  ;;  %v1548_v37 = vadd.f32 %v1547_v34, %v5499_v46  ;;  %v1579_v41 = vmax.f32 %v1471_v26, 0.0 }
 0x3c2   :  { %v1582_v39 = vmax.f32 %v1473_v31, 0.0  ;;  %v1584_v40 = vmax.f32 %v1546_v32, 0.0 }
 0x3c3   :  { %v1583_v42 = vmax.f32 %v1475_v36, 0.0  ;;  %v1585_v47 = vmax.f32 %v1548_v37, 0.0 }
 0x3c4   :  { %v1606_v25 = vpack.c.bf16 %v1582_v39, %v1578_v38  ;;  %v1608_v48 = vpack.c.bf16 %v1584_v40, %v1580_v30 }
 0x3c5   :  { %v1607_v50 = vpack.c.bf16 %v1583_v42, %v1579_v41  ;;  %v1609_v51 = vpack.c.bf16 %v1585_v47, %v1581_v35  ;;  %v1478_v52 = vpop.f32.mrb[48].mxu1  ;;  %v1551_v53 = vpop.f32.mrb[52].mxu0 }
 0x3c6   :  { %v1479_v54 = vadd.f32 %v1478_v52, %v5490_v43  ;;  %v1552_v55 = vadd.f32 %v1551_v53, %v5493_v44  ;;  %v1480_v56 = vpop.f32.mrb[49].mxu1  ;;  %v1553_v57 = vpop.f32.mrb[53].mxu0 }
 0x3c7   :  { %v1481_v61 = vadd.f32 %v1480_v56, %v5496_v45  ;;  %v1554_v5 = vadd.f32 %v1553_v57, %v5499_v46  ;;  %v1482_v6 = vpop.f32.mrb[50].mxu1  ;;  %v1555_v0 = vpop.f32.mrb[54].mxu0  ;;  %1915 = vmatprep.mubr.bf16.mxu1 %v1607_v50  ;;  %1980 = vmatprep.mubr.bf16.mxu0 %v1609_v51 }
 0x3c8   :  { %v1588_v7 = vmax.f32 %v1552_v55, 0.0  ;;  %v1483_v4 = vadd.f32 %v1482_v6, %v5490_v43  ;;  %v1556_v8 = vadd.f32 %v1555_v0, %v5493_v44  ;;  %v1484_v9 = vpop.f32.mrb[51].mxu1  ;;  %v1557_v10 = vpop.f32.mrb[55].mxu0  ;;  %1916 = vmatmul.mubr.bf16.gmra.mrb[60].mxu1 %v1606_v25  ;;  %1981 = vmatmul.mubr.bf16.gmra.mrb[64].mxu0 %v1608_v48  ;;  %v1586_v14 = vmax.f32 %v1479_v54, 0.0  ;;  %v4012_v0 = vld [vmem:[%s6035_s3 + $0x168] sm:$0xff] }
 0x3c9   :  { %v1589_v11 = vmax.f32 %v1554_v5, 0.0  ;;  %v1485_v12 = vadd.f32 %v1484_v9, %v5496_v45  ;;  %v1558_v13 = vadd.f32 %v1557_v10, %v5499_v46  ;;  %v1587_v17 = vmax.f32 %v1481_v61, 0.0  ;;  %v4008_v61 = vld [vmem:[%s6035_s3 + $0x148] sm:$0xff] }
 0x3ca   :  { %v1590_v15 = vmax.f32 %v1483_v4, 0.0  ;;  %v1592_v16 = vmax.f32 %v1556_v8, 0.0  ;;  %v4020_v9 = vld [vmem:[%s6035_s3 + $0x1a8] sm:$0x11] }
 0x3cb   :  { %v1591_v18 = vmax.f32 %v1485_v12, 0.0  ;;  %v1593_v19 = vmax.f32 %v1558_v13, 0.0  ;;  %v4050_v10 = vcombine.high %v4020_v9, %v4020_v9 }
 0x3cc   :  { %v1610_v20 = vpack.c.bf16 %v1590_v15, %v1586_v14  ;;  %v1612_v21 = vpack.c.bf16 %v1592_v16, %v1588_v7  ;;  %v4016_v7 = vld [vmem:[%s6035_s3 + $0x188] sm:$0xff]  ;;  %v5562_v15 = vld [vmem:[%s6036_s4 + $0x21] ss:$0 sm:$0xff] }
 0x3cd   :  { %v1611_v22 = vpack.c.bf16 %v1591_v18, %v1587_v17  ;;  %v1613_v23 = vpack.c.bf16 %v1593_v19, %v1589_v11  ;;  %v1488_v24 = vpop.f32.mrb[52].mxu1  ;;  %v1561_v26 = vpop.f32.mrb[56].mxu0  ;;  %v4042_v4 = vcombine.high %v4012_v0, %v4016_v7  ;;  %v4041_v8 = vcombine.low %v4012_v0, %v4016_v7 }
 0x3ce   :  { %v1489_v27 = vadd.f32 %v1488_v24, %v5490_v43  ;;  %v1562_v28 = vadd.f32 %v1561_v26, %v5493_v44  ;;  %v1490_v29 = vpop.f32.mrb[53].mxu1  ;;  %v1563_v30 = vpop.f32.mrb[57].mxu0  ;;  %v4049_v11 = vcombine.low %v4020_v9, %v4020_v9 }
 0x3cf   :  { %v1491_v31 = vadd.f32 %v1490_v29, %v5496_v45  ;;  %v1564_v32 = vadd.f32 %v1563_v30, %v5499_v46  ;;  %v1492_v33 = vpop.f32.mrb[54].mxu1  ;;  %v1565_v34 = vpop.f32.mrb[58].mxu0  ;;  %1923 = vmatprep.mubr.bf16.mxu1 %v1611_v22  ;;  %1988 = vmatprep.mubr.bf16.mxu0 %v1613_v23 }
 0x3d0   :  { %v1596_v35 = vmax.f32 %v1562_v28, 0.0  ;;  %v1493_v36 = vadd.f32 %v1492_v33, %v5490_v43  ;;  %v1566_v37 = vadd.f32 %v1565_v34, %v5493_v44  ;;  %v1494_v38 = vpop.f32.mrb[55].mxu1  ;;  %v1567_v39 = vpop.f32.mrb[59].mxu0  ;;  %1924 = vmatmul.mubr.bf16.gmra.mrb[64].mxu1 %v1610_v20  ;;  %1989 = vmatmul.mubr.bf16.gmra.mrb[68].mxu0 %v1612_v21  ;;  %v1594_v47 = vmax.f32 %v1489_v27, 0.0  ;;  %v3996_v44 = vld [vmem:[%s6035_s3 + $0xe8] sm:$0xff] }
 0x3d1   :  { %v1597_v40 = vmax.f32 %v1564_v32, 0.0  ;;  %v1495_v41 = vadd.f32 %v1494_v38, %v5496_v45  ;;  %v1568_v42 = vadd.f32 %v1567_v39, %v5499_v46  ;;  %v1595_v50 = vmax.f32 %v1491_v31, 0.0  ;;  %v4000_v45 = vld [vmem:[%s6035_s3 + $0x108] sm:$0xff] }
 0x3d2   :  { %v1598_v25 = vmax.f32 %v1493_v36, 0.0  ;;  %v1600_v48 = vmax.f32 %v1566_v37, 0.0  ;;  %v4004_v46 = vld [vmem:[%s6035_s3 + $0x128] sm:$0xff]  ;;  %v4025_v56 = vcombine.low %v3996_v44, %v4000_v45  ;;  %v4026_v57 = vcombine.high %v3996_v44, %v4000_v45 }
 0x3d3   :  { %v1599_v51 = vmax.f32 %v1495_v41, 0.0  ;;  %v1601_v52 = vmax.f32 %v1568_v42, 0.0  ;;  %v4034_v5 = vcombine.high %v4004_v46, %v4008_v61  ;;  %v4033_v6 = vcombine.low %v4004_v46, %v4008_v61 }
 0x3d4   :  { %v1614_v53 = vpack.c.bf16 %v1598_v25, %v1594_v47  ;;  %v1616_v54 = vpack.c.bf16 %v1600_v48, %v1596_v35  ;;  %2321 = vmatprep.subr.bf16.mxu0 %v4026_v57  ;;  %v2263_v12 = vsel %vm178_vm0, %v4049_v11, 0 }
 0x3d5   :  { %v1615_v43 = vpack.c.bf16 %v1599_v51, %v1595_v50  ;;  %v1617_v55 = vpack.c.bf16 %v1601_v52, %v1597_v40  ;;  %2322 = vmatpush1.bf16.msra.mxu0 %v4025_v56 }
 0x3d6   :  { %2323 = vmatprep.subr.bf16.mxu0 %v4034_v5 }
 0x3d7   :  { %1931 = vmatprep.mubr.bf16.mxu1 %v1615_v43  ;;  %1996 = vmatprep.mubr.bf16.mxu0 %v1617_v55 }
 0x3d8   :  { %1932 = vmatmul.mubr.bf16.gmra.mrb[68].mxu1 %v1614_v53  ;;  %1997 = vmatmul.mubr.bf16.gmra.mrb[72].mxu0 %v1616_v54 }
 0x3d9   :  { %4586 = vmatprep.mubr.msk.f32.mxu1 %vm4919_vm2, %v4920_v3  ;;  %2353 = vmatprep.mubr.bf16.mxu0 %v4917_v2 }
 0x3da   :  { %2324 = vmatpush1.bf16.msra.mxu0 %v4033_v6 }
 0x3db   :  { %2325 = vmatprep.subr.bf16.mxu0 %v4042_v4 }
 0x3de   :  { %2326 = vmatpush1.bf16.msra.mxu0 %v4041_v8 }
 0x3df   :  { %4057 = vmatprep.subr.msk.bf16.mxu0 %vm178_vm0, %v4050_v10 }
 0x3e2   :  { %2328 = vmatpush1.bf16.msra.mxu0 %v2263_v12 }
 0x493   :  { %v4389_v13 = vpop.f32.mrb[56].mxu1  ;;  %v4429_v14 = vpop.f32.mrb[60].mxu0 }
 0x494   :  { %v4390_v16 = vpop.f32.mrb[57].mxu1  ;;  %v4430_v17 = vpop.f32.mrb[61].mxu0 }
 0x495   :  { %v4391_v18 = vadd.f32 %v4390_v16, %v4389_v13  ;;  %v4431_v19 = vadd.f32 %v4430_v17, %v4429_v14  ;;  %v4392_v20 = vpop.f32.mrb[58].mxu1  ;;  %v4432_v21 = vpop.f32.mrb[62].mxu0 }
 0x496   :  { %v4393_v22 = vpop.f32.mrb[59].mxu1  ;;  %v4433_v23 = vpop.f32.mrb[63].mxu0 }
 0x497   :  { %v1910_v24 = vadd.f32 %v4391_v18, %v5562_v15  ;;  %v4394_v26 = vadd.f32 %v4393_v22, %v4392_v20  ;;  %v4434_v27 = vadd.f32 %v4433_v23, %v4432_v21 }
 0x499   :  { %v1975_v28 = vadd.f32 %v4431_v19, %v1910_v24  ;;  %v1913_v29 = vadd.f32 %v4394_v26, %v5562_v15 }
 0x49b   :  { %v1978_v30 = vadd.f32 %v4434_v27, %v1913_v29  ;;  %v4395_v31 = vpop.f32.mrb[60].mxu1  ;;  %v4435_v32 = vpop.f32.mrb[64].mxu0  ;;  %v2005_v35 = vmax.f32 %v1975_v28, 0.0 }
 0x49c   :  { %v4396_v33 = vpop.f32.mrb[61].mxu1  ;;  %v4436_v34 = vpop.f32.mrb[65].mxu0 }
 0x49d   :  { %v2006_v36 = vmax.f32 %v1978_v30, 0.0  ;;  %v4397_v37 = vadd.f32 %v4396_v33, %v4395_v31  ;;  %v4437_v38 = vadd.f32 %v4436_v34, %v4435_v32  ;;  %v4398_v39 = vpop.f32.mrb[62].mxu1  ;;  %v4438_v40 = vpop.f32.mrb[66].mxu0  ;;  %v3995_v34 = vld [vmem:[%s6035_s3 + $0xe0] sm:$0xff] }
 0x49e   :  { %v4399_v41 = vpop.f32.mrb[63].mxu1  ;;  %v4439_v42 = vpop.f32.mrb[67].mxu0 }
 0x49f   :  { %v4621_v47 = vpack.c.bf16 %v2006_v36, %v2005_v35  ;;  %v1918_v25 = vadd.f32 %v4397_v37, %v5562_v15  ;;  %v4400_v48 = vadd.f32 %v4399_v41, %v4398_v39  ;;  %v4440_v50 = vadd.f32 %v4439_v42, %v4438_v40  ;;  %v3999_v35 = vld [vmem:[%s6035_s3 + $0x100] sm:$0xff] }
 0x4a0   :  { %v4007_v40 = vld [vmem:[%s6035_s3 + $0x140] sm:$0xff]  ;;  %v4023_v41 = vcombine.low %v3995_v34, %v3999_v35 }
 0x4a1   :  { %v1983_v51 = vadd.f32 %v4437_v38, %v1918_v25  ;;  %v1921_v52 = vadd.f32 %v4400_v48, %v5562_v15  ;;  %4622 = vmatpush3.bf16.msra.mxu1 %v4621_v47  ;;  %v4024_v38 = vcombine.high %v3995_v34, %v3999_v35  ;;  %v4011_v47 = vld [vmem:[%s6035_s3 + $0x160] sm:$0xff]  ;;  %v4825_v35 = vld [vmem:[%s6033_s1 + $0xe8] ss:$16 sps:$4 sm:$0xff]  }
 0x4a2   :  { %4623 = vmatprep.subr.bf16.mxu1 %v4918_v1  ;;  %v4015_v25 = vld [vmem:[%s6035_s3 + $0x180] sm:$0xff] }
 0x4a3   :  { %v1986_v53 = vadd.f32 %v4440_v50, %v1921_v52  ;;  %v4401_v54 = vpop.f32.mrb[64].mxu1  ;;  %v4441_v43 = vpop.f32.mrb[68].mxu0  ;;  %v2007_v45 = vmax.f32 %v1983_v51, 0.0  ;;  %v4040_v50 = vcombine.high %v4011_v47, %v4015_v25  ;;  %v4019_v51 = vld [vmem:[%s6035_s3 + $0x1a0] sm:$0x11]  ;;  %v4039_v52 = vcombine.low %v4011_v47, %v4015_v25 }
 0x4a4   :  { %v4402_v55 = vpop.f32.mrb[65].mxu1  ;;  %v4442_v44 = vpop.f32.mrb[69].mxu0  ;;  %v4822_v34 = vld [vmem:[%s6033_s1 + $0xe0] ss:$16 sps:$4 sm:$0xff]   ;;  %v4837_v25 = vld [vmem:[%s6033_s1 + $0x128] ss:$16 sps:$4 sm:$0xff]  }
 0x4a5   :  { %v2008_v46 = vmax.f32 %v1986_v53, 0.0  ;;  %v4403_v56 = vadd.f32 %v4402_v55, %v4401_v54  ;;  %v4443_v57 = vadd.f32 %v4442_v44, %v4441_v43  ;;  %v4404_v61 = vpop.f32.mrb[66].mxu1  ;;  %v4444_v5 = vpop.f32.mrb[70].mxu0  ;;  %v4048_v53 = vcombine.high %v4019_v51, %v4019_v51  ;;  %v3997_v43 = vld [vmem:[%s6035_s3 + $0xf0] sm:$0xff]  ;;  %v3998_v44 = vld [vmem:[%s6035_s3 + $0xf8] sm:$0xff] }
 0x4a6   :  { %v4405_v6 = vpop.f32.mrb[67].mxu1  ;;  %v4445_v0 = vpop.f32.mrb[71].mxu0  ;;  %v4047_v54 = vcombine.low %v4019_v51, %v4019_v51  ;;  %v4001_v55 = vld [vmem:[%s6035_s3 + $0x110] sm:$0xff] }
 0x4a7   :  { %v4624_v7 = vpack.c.bf16 %v2008_v46, %v2007_v45  ;;  %v1926_v4 = vadd.f32 %v4403_v56, %v5562_v15  ;;  %v4406_v8 = vadd.f32 %v4405_v6, %v4404_v61  ;;  %v4446_v9 = vadd.f32 %v4445_v0, %v4444_v5  ;;  %v4002_v46 = vld [vmem:[%s6035_s3 + $0x118] sm:$0xff]  ;;  %v4005_v5 = vld [vmem:[%s6035_s3 + $0x130] sm:$0xff] }
 0x4a8   :  { %v4028_v45 = vcombine.high %v3997_v43, %v4001_v55  ;;  %v4027_v56 = vcombine.low %v3997_v43, %v4001_v55  ;;  %v4030_v61 = vcombine.high %v3998_v44, %v4002_v46  ;;  %v4009_v6 = vld [vmem:[%s6035_s3 + $0x150] sm:$0xff]  ;;  %v4006_v0 = vld [vmem:[%s6035_s3 + $0x138] sm:$0xff]  ;;  %v4849_v43 = vld [vmem:[%s6034_s2 + $0x2c0] sm:$0xff]  }
 0x4a9   :  { %v1991_v10 = vadd.f32 %v4443_v57, %v1926_v4  ;;  %v1929_v11 = vadd.f32 %v4406_v8, %v5562_v15  ;;  %4625 = vmatpush3.bf16.msra.mxu1 %v4624_v7  ;;  %v4029_v57 = vcombine.low %v3998_v44, %v4002_v46  ;;  %v4010_v7 = vld [vmem:[%s6035_s3 + $0x158] sm:$0xff]  ;;  %v4834_v47 = vld [vmem:[%s6033_s1 + $0x120] ss:$16 sps:$4 sm:$0xff]   ;;  %v4852_v46 = vld [vmem:[%s6034_s2 + $0x248] sm:$0xff]  }
 0x4aa   :  { %4626 = vmatprep.subr.bf16.mxu1 %v4918_v1  ;;  %2403 = vmatprep.subr.bf16.mxu0 %v4030_v61  ;;  %v4844_v55 = vld [vmem:[%s6032_s0 + $0x40] sm:$0xff]   ;;  %v4855_v61 = vld [vmem:[%s6034_s2 + $0x288] sm:$0xff]  }
 0x4ab   :  { %v1994_v12 = vadd.f32 %v4446_v9, %v1929_v11  ;;  %v4407_v13 = vpop.f32.mrb[68].mxu1  ;;  %v4447_v14 = vpop.f32.mrb[72].mxu0  ;;  %v2009_v18 = vmax.f32 %v1991_v10, 0.0  ;;  %v4036_v10 = vcombine.high %v4005_v5, %v4009_v6  ;;  %v4038_v11 = vcombine.high %v4006_v0, %v4010_v7  ;;  %v4850_v44 = vld [vmem:[%s6034_s2 + $0x200] sm:$0xff]  }
 0x4ac   :  { %v4408_v16 = vpop.f32.mrb[69].mxu1  ;;  %v4448_v17 = vpop.f32.mrb[73].mxu0 }
 0x4ad   :  { %v2010_v19 = vmax.f32 %v1994_v12, 0.0  ;;  %v4409_v20 = vadd.f32 %v4408_v16, %v4407_v13  ;;  %v4449_v21 = vadd.f32 %v4448_v17, %v4447_v14  ;;  %v4410_v22 = vpop.f32.mrb[70].mxu1  ;;  %v4450_v23 = vpop.f32.mrb[74].mxu0  ;;  %v4013_v12 = vld [vmem:[%s6035_s3 + $0x170] sm:$0xff]  ;;  %v4014_v14 = vld [vmem:[%s6035_s3 + $0x178] sm:$0xff]  ;;  %v4035_v17 = vcombine.low %v4005_v5, %v4009_v6 }
 0x4ae   :  { %v4411_v24 = vpop.f32.mrb[71].mxu1  ;;  %v4451_v26 = vpop.f32.mrb[75].mxu0  ;;  %v4017_v13 = vld [vmem:[%s6035_s3 + $0x190] sm:$0xff]  ;;  %v4018_v16 = vld [vmem:[%s6035_s3 + $0x198] sm:$0xff] }
 0x4af   :  { %v4627_v27 = vpack.c.bf16 %v2010_v19, %v2009_v18  ;;  %v1934_v28 = vadd.f32 %v4409_v20, %v5562_v15  ;;  %v4412_v29 = vadd.f32 %v4411_v24, %v4410_v22  ;;  %v4452_v30 = vadd.f32 %v4451_v26, %v4450_v23  ;;  %v4022_v22 = vld [vmem:[%s6035_s3 + $0x1b8] sm:$0x11]  ;;  %v4856_v5 = vld [vmem:[%s6034_s2 + $0x250] sm:$0xff]  }
 0x4b0   :  { %v4037_v18 = vcombine.low %v4006_v0, %v4010_v7  ;;  %v4044_v19 = vcombine.high %v4013_v12, %v4017_v13  ;;  %v4046_v20 = vcombine.high %v4014_v14, %v4018_v16  ;;  %v4043_v23 = vcombine.low %v4013_v12, %v4017_v13  ;;  %v4857_v6 = vld [vmem:[%s6034_s2 + $0x2d0] sm:$0xff]   ;;  %v4845_v0 = vld [vmem:[%s6032_s0 + $0x48] sm:$0xff]   ;;  %v4864_v12 = vld [vmem:[%s6034_s2 + $0x260] sm:$0xff]  }
 0x4b1   :  { %v1999_v31 = vadd.f32 %v4449_v21, %v1934_v28  ;;  %v1937_v32 = vadd.f32 %v4412_v29, %v5562_v15  ;;  %4628 = vmatpush3.bf16.msra.mxu1 %v4627_v27  ;;  %v4003_v15 = vld [vmem:[%s6035_s3 + $0x120] sm:$0xff]  ;;  %v4021_v21 = vld [vmem:[%s6035_s3 + $0x1b0] sm:$0x11]  ;;  %v4045_v24 = vcombine.low %v4014_v14, %v4018_v16  ;;  %v4054_v27 = vcombine.high %v4022_v22, %v4022_v22 }
 0x4b2   :  { %4629 = vmatprep.subr.bf16.mxu1 %v4918_v1  ;;  %v4032_v42 = vcombine.high %v4003_v15, %v4007_v40  ;;  %v4031_v48 = vcombine.low %v4003_v15, %v4007_v40  ;;  %v4052_v26 = vcombine.high %v4021_v21, %v4021_v21  ;;  %v4051_v28 = vcombine.low %v4021_v21, %v4021_v21  ;;  %v4836_v15 = vld [vmem:[%s6033_s1 + $0x124] ss:$16 sps:$4 sm:$0xff]   ;;  %v4839_v40 = vld [vmem:[%s6033_s1 + $0x12c] ss:$16 sps:$4 sm:$0xff]  }
 0x4b3   :  { %v2002_v33 = vadd.f32 %v4452_v30, %v1937_v32  ;;  %v2011_v36 = vmax.f32 %v1999_v31, 0.0  ;;  %v4053_v29 = vcombine.low %v4022_v22, %v4022_v22  ;;  %v4824_v32 = vld [vmem:[%s6033_s1 + $0xe4] ss:$16 sps:$4 sm:$0xff]   ;;  %v4870_v21 = vld [vmem:[%s6034_s2 + $0x228] sm:$0xff]  }
 0x4b4   :  { %v2269_v30 = vsel %vm178_vm0, %v4051_v28, 0  ;;  %v4858_v7 = vld [vmem:[%s6034_s2 + $0x210] sm:$0xff]   ;;  %v4865_v13 = vld [vmem:[%s6034_s2 + $0x2e0] sm:$0xff]   ;;  %v4871_v22 = vld [vmem:[%s6034_s2 + $0x2a8] sm:$0xff]  }
 0x4b5   :  { %v2012_v37 = vmax.f32 %v2002_v33, 0.0  ;;  %v2275_v31 = vsel %vm178_vm0, %v4053_v29, 0  ;;  %v4827_v33 = vld [vmem:[%s6033_s1 + $0xec] ss:$16 sps:$4 sm:$0xff]   ;;  %v4846_v14 = vld [vmem:[%s6032_s0 + $0x50] sm:$0xff]   ;;  %v4866_v16 = vld [vmem:[%s6034_s2 + $0x220] sm:$0xff]  }
 0x4b6   :  { %v4876_v28 = vld [vmem:[%s6034_s2 + $0x278] sm:$0xff]  }
 0x4b7   :  { %v4630_v39 = vpack.c.bf16 %v2012_v37, %v2011_v36  ;;  %v4830_v36 = vld [vmem:[%s6033_s1 + $0x104] ss:$16 sps:$4 sm:$0xff]   ;;  %v4833_v37 = vld [vmem:[%s6033_s1 + $0x10c] ss:$16 sps:$4 sm:$0xff]  }
 0x4b8   :  { %v4877_v29 = vld [vmem:[%s6034_s2 + $0x2f8] sm:$0xff]  }
 0x4b9   :  { %4631 = vmatpush3.bf16.msra.mxu1 %v4630_v39  ;;  %v4831_v39 = vld [vmem:[%s6033_s1 + $0x108] ss:$16 sps:$4 sm:$0xff]  }
 0x4ba   :  { %2280 = vmatprep.subr.bf16.mxu1 %v4024_v38  ;;  %v4828_v38 = vld [vmem:[%s6033_s1 + $0x100] ss:$16 sps:$4 sm:$0xff]  }
 0x4bc   :  { %4587 = vmatmul.mubr.msk.f32.vlgmr.msra.gmra.mrb[72].mxu1 %vm779_vm3, %v5247_v49  ;;  %v2257_v49 = vsel %vm178_vm0, %v4047_v54, 0 }
 0x4bd   :  { %2281 = vmatpush1.bf16.msra.mxu1 %v4023_v41  ;;  %2312 = vmatprep.mubr.bf16.mxu1 %v4917_v2  ;;  %v4084_v41 = vld [vmem:[%s6033_s1 + $0x140] sm:$0x11] }
 0x4be   :  { %2282 = vmatprep.subr.bf16.mxu1 %v4032_v42  ;;  %v4085_v42 = vld [vmem:[%s6033_s1 + $0x148] sm:$0x11]  ;;  %v4102_v51 = vcombine.low %v4084_v41, %v4084_v41 }
 0x4c1   :  { %2283 = vmatpush1.bf16.msra.mxu1 %v4031_v48  ;;  %v4103_v48 = vcombine.high %v4084_v41, %v4084_v41 }
 0x4c2   :  { %2284 = vmatprep.subr.bf16.mxu1 %v4040_v50  ;;  %v4105_v50 = vcombine.high %v4085_v42, %v4085_v42 }
 0x4c5   :  { %2285 = vmatpush1.bf16.msra.mxu1 %v4039_v52  ;;  %v4104_v52 = vcombine.low %v4085_v42, %v4085_v42 }
 0x4c6   :  { %4055 = vmatprep.subr.msk.bf16.mxu1 %vm178_vm0, %v4048_v53  ;;  %v2603_v53 = vsel %vm178_vm0, %v4102_v51, 0 }
 0x4c7   :  { %v2609_v54 = vsel %vm178_vm0, %v4104_v52, 0 }
 0x4c9   :  { %2287 = vmatpush1.bf16.msra.mxu1 %v2257_v49  ;;  %v4848_v49 = vld [vmem:[%s6034_s2 + $0x240] sm:$0xff]  }
 0x4ca   :  { %2362 = vmatprep.subr.bf16.mxu1 %v4028_v45  ;;  %v4851_v45 = vld [vmem:[%s6034_s2 + $0x280] sm:$0xff]  }
 0x58f   :  { %v2079_v4 = vpop.f32.mrb[72].mxu1 }
 0x590   :  { %v2083_v8 = vpack.c.bf16 %v2079_v4, %v2079_v4  ;;  %v4588_v9 = vpop.f32.mrb[73].mxu1  ;;  %v4859_v4 = vld [vmem:[%s6034_s2 + $0x290] sm:$0xff]  }
 0x591   :  { %v4861_v9 = vld [vmem:[%s6034_s2 + $0x2d8] sm:$0xff]  }
 0x592   :  { %4056 = vmatmul.mubr.msk.bf16.vlgmr.msra.gmra.mrb[32].mxu1 %vm165_vm1, %v2083_v8  ;;  %4058 = vmatmul.mubr.msk.bf16.vlgmr.msra.gmra.mrb[36].mxu0 %vm165_vm1, %v2083_v8 }
 0x593   :  { %2363 = vmatpush1.bf16.msra.mxu1 %v4027_v56  ;;  %2404 = vmatpush1.bf16.msra.mxu0 %v4029_v57  ;;  %v4853_v56 = vld [vmem:[%s6034_s2 + $0x2c8] sm:$0xff]  }
 0x594   :  { %2364 = vmatprep.subr.bf16.mxu1 %v4036_v10  ;;  %2405 = vmatprep.subr.bf16.mxu0 %v4038_v11  ;;  %v4854_v57 = vld [vmem:[%s6034_s2 + $0x208] sm:$0xff]   ;;  %v4862_v10 = vld [vmem:[%s6034_s2 + $0x218] sm:$0xff]  }
 0x595   :  { %2394 = vmatprep.mubr.bf16.mxu1 %v4917_v2  ;;  %2435 = vmatprep.mubr.bf16.mxu0 %v4917_v2  ;;  %v4863_v11 = vld [vmem:[%s6034_s2 + $0x298] sm:$0xff]  }
 0x597   :  { %2365 = vmatpush1.bf16.msra.mxu1 %v4035_v17  ;;  %2406 = vmatpush1.bf16.msra.mxu0 %v4037_v18  ;;  %v4867_v17 = vld [vmem:[%s6034_s2 + $0x2a0] sm:$0xff]   ;;  %v4868_v18 = vld [vmem:[%s6034_s2 + $0x268] sm:$0xff]  }
 0x598   :  { %2366 = vmatprep.subr.bf16.mxu1 %v4044_v19  ;;  %2407 = vmatprep.subr.bf16.mxu0 %v4046_v20  ;;  %v4869_v19 = vld [vmem:[%s6034_s2 + $0x2e8] sm:$0xff]   ;;  %v4847_v20 = vld [vmem:[%s6032_s0 + $0x58] sm:$0xff]  }
 0x59b   :  { %2367 = vmatpush1.bf16.msra.mxu1 %v4043_v23  ;;  %2408 = vmatpush1.bf16.msra.mxu0 %v4045_v24  ;;  %v4872_v23 = vld [vmem:[%s6034_s2 + $0x270] sm:$0xff]  }
 0x59c   :  { %4059 = vmatprep.subr.msk.bf16.mxu1 %vm178_vm0, %v4052_v26  ;;  %4061 = vmatprep.subr.msk.bf16.mxu0 %vm178_vm0, %v4054_v27  ;;  %v4873_v24 = vld [vmem:[%s6034_s2 + $0x2f0] sm:$0xff]  }
 0x59d   :  { %v4874_v26 = vld [vmem:[%s6034_s2 + $0x230] sm:$0xff]  }
 0x59e   :  { %v4875_v27 = vld [vmem:[%s6034_s2 + $0x2b0] sm:$0xff]  }
 0x59f   :  { %2369 = vmatpush1.bf16.msra.mxu1 %v2269_v30  ;;  %2410 = vmatpush1.bf16.msra.mxu0 %v2275_v31  ;;  %v4878_v30 = vld [vmem:[%s6034_s2 + $0x238] sm:$0xff]  }
 0x5a0   :  { %2614 = vmatprep.subr.bf16.mxu0 %v4824_v32  ;;  %2687 = vmatprep.subr.bf16.mxu1 %v4827_v33  ;;  %v4879_v31 = vld [vmem:[%s6034_s2 + $0x2b8] sm:$0xff]  }
 0x5a1   :  { %v4063_v32 = vld [vmem:[%s6036_s4 + $0x2] ss:$8 sm:$0xf] }
 0x5a2   :  { %4060 = vmatmul.mubr.msk.bf16.vlgmr.msra.gmra.mrb[36].mxu1 %vm165_vm1, %v2083_v8  ;;  %4062 = vmatmul.mubr.msk.bf16.vlgmr.msra.gmra.mrb[40].mxu0 %vm165_vm1, %v2083_v8  ;;  %v4860_v8 = vld [vmem:[%s6034_s2 + $0x258] sm:$0xff]   ;;  %v5828_v33 = vrot.slane %v4063_v32, %v5131_v59 }
 0x5a3   :  { %2615 = vmatpush1.bf16.msra.mxu0 %v4822_v34  ;;  %2688 = vmatpush1.bf16.msra.mxu1 %v4825_v35  ;;  %v5831_v34 = vrot.slane %v4063_v32, %v5134_v60  ;;  %v5834_v35 = vrot.slane %v4063_v32, %v5140_v62 }
 0x5a4   :  { %2616 = vmatprep.subr.bf16.mxu0 %v4830_v36  ;;  %2689 = vmatprep.subr.bf16.mxu1 %v4833_v37  ;;  %v5837_v36 = vrot.slane %v4063_v32, %v5143_v63 }
 0x5a5   :  { %2646 = vmatprep.mubr.bf16.mxu0 %v4917_v2  ;;  %2719 = vmatprep.mubr.bf16.mxu1 %v4917_v2 }
 0x5a7   :  { %2617 = vmatpush1.bf16.msra.mxu0 %v4828_v38  ;;  %2690 = vmatpush1.bf16.msra.mxu1 %v4831_v39 }
 0x5a8   :  { %2618 = vmatprep.subr.bf16.mxu0 %v4836_v15  ;;  %2691 = vmatprep.subr.bf16.mxu1 %v4839_v40 }
 0x5ab   :  { %2619 = vmatpush1.bf16.msra.mxu0 %v4834_v47  ;;  %2692 = vmatpush1.bf16.msra.mxu1 %v4837_v25 }
 0x5ac   :  { %4106 = vmatprep.subr.msk.bf16.mxu0 %vm178_vm0, %v4103_v48  ;;  %4111 = vmatprep.subr.msk.bf16.mxu1 %vm178_vm0, %v4105_v50 }
 0x5af   :  { %2621 = vmatpush1.bf16.msra.mxu0 %v2603_v53  ;;  %2694 = vmatpush1.bf16.msra.mxu1 %v2609_v54 }
 0x5b0   :  { %4462 = vmatprep.subr.bf16.mxu0 %v4848_v49  ;;  %4502 = vmatprep.subr.bf16.mxu1 %v4849_v43 }
 0x5b2   :  { %4107 = vmatmul.mubr.msk.bf16.vlgmr.msra.gmra.mrb[76].mxu0 %vm165_vm1, %v4844_v55  ;;  %4112 = vmatmul.mubr.msk.bf16.vlgmr.msra.gmra.mrb[76].mxu1 %vm165_vm1, %v4844_v55 }
 0x5b3   :  { %2656 = vmatprep.mubr.bf16.mxu0 %v4917_v2  ;;  %2729 = vmatprep.mubr.bf16.mxu1 %v4917_v2 }
 0x5b4   :  { %4463 = vmatpush3.bf16.msra.mxu0 %v4850_v44  ;;  %4503 = vmatpush3.bf16.msra.mxu1 %v4851_v45 }
 0x5b5   :  { %4464 = vmatprep.subr.bf16.mxu0 %v4852_v46  ;;  %4504 = vmatprep.subr.bf16.mxu1 %v4853_v56 }
 0x5b8   :  { %4465 = vmatpush3.bf16.msra.mxu0 %v4854_v57  ;;  %4505 = vmatpush3.bf16.msra.mxu1 %v4855_v61 }
 0x5b9   :  { %4466 = vmatprep.subr.bf16.mxu0 %v4856_v5  ;;  %4506 = vmatprep.subr.bf16.mxu1 %v4857_v6 }
 0x5ba   :  { %4108 = vmatmul.mubr.msk.bf16.gmra.mrb[80].mxu0 %vm165_vm1, %v4845_v0  ;;  %4113 = vmatmul.mubr.msk.bf16.gmra.mrb[80].mxu1 %vm165_vm1, %v4845_v0 }
 0x5bb   :  { %2666 = vmatprep.mubr.bf16.mxu0 %v4917_v2  ;;  %2739 = vmatprep.mubr.bf16.mxu1 %v4917_v2 }
 0x5bc   :  { %4467 = vmatpush3.bf16.msra.mxu0 %v4858_v7  ;;  %4507 = vmatpush3.bf16.msra.mxu1 %v4859_v4 }
 0x5bd   :  { %4468 = vmatprep.subr.bf16.mxu0 %v4860_v8  ;;  %4508 = vmatprep.subr.bf16.mxu1 %v4861_v9 }
 0x5c0   :  { %4469 = vmatpush3.bf16.msra.mxu0 %v4862_v10  ;;  %4509 = vmatpush3.bf16.msra.mxu1 %v4863_v11 }
 0x5c1   :  { %4470 = vmatprep.subr.bf16.mxu0 %v4864_v12  ;;  %4510 = vmatprep.subr.bf16.mxu1 %v4865_v13 }
 0x5c2   :  { %4109 = vmatmul.mubr.msk.bf16.gmra.mrb[84].mxu0 %vm165_vm1, %v4846_v14  ;;  %4114 = vmatmul.mubr.msk.bf16.gmra.mrb[84].mxu1 %vm165_vm1, %v4846_v14 }
 0x5c3   :  { %2676 = vmatprep.mubr.bf16.mxu0 %v4917_v2  ;;  %2749 = vmatprep.mubr.bf16.mxu1 %v4917_v2 }
 0x5c4   :  { %4471 = vmatpush3.bf16.msra.mxu0 %v4866_v16  ;;  %4511 = vmatpush3.bf16.msra.mxu1 %v4867_v17 }
 0x5c5   :  { %4472 = vmatprep.subr.bf16.mxu0 %v4868_v18  ;;  %4512 = vmatprep.subr.bf16.mxu1 %v4869_v19 }
 0x5c8   :  { %4473 = vmatpush3.bf16.msra.mxu0 %v4870_v21  ;;  %4513 = vmatpush3.bf16.msra.mxu1 %v4871_v22 }
 0x5c9   :  { %4474 = vmatprep.subr.bf16.mxu0 %v4872_v23  ;;  %4514 = vmatprep.subr.bf16.mxu1 %v4873_v24 }
 0x5ca   :  { %4110 = vmatmul.mubr.msk.bf16.gmra.mrb[88].mxu0 %vm165_vm1, %v4847_v20  ;;  %4115 = vmatmul.mubr.msk.bf16.gmra.mrb[88].mxu1 %vm165_vm1, %v4847_v20 }
 0x5cc   :  { %4475 = vmatpush3.bf16.msra.mxu0 %v4874_v26  ;;  %4515 = vmatpush3.bf16.msra.mxu1 %v4875_v27 }
 0x5cd   :  { %4476 = vmatprep.subr.bf16.mxu0 %v4876_v28  ;;  %4516 = vmatprep.subr.bf16.mxu1 %v4877_v29 }
 0x5d0   :  { %4477 = vmatpush3.bf16.msra.mxu0 %v4878_v30  ;;  %4517 = vmatpush3.bf16.msra.mxu1 %v4879_v31 }
 0x5d1   :  { %4632 = vmatprep.subr.bf16.mxu0 %v4918_v1 }
 0x685   :  { %v2648_v37 = vpop.f32.mrb[76].mxu0  ;;  %v2721_v38 = vpop.f32.mrb[76].mxu1 }
 0x686   :  { %v2649_v39 = vadd.f32 %v2648_v37, %v5828_v33  ;;  %v2722_v15 = vadd.f32 %v2721_v38, %v5831_v34  ;;  %v2650_v40 = vpop.f32.mrb[77].mxu0  ;;  %v2723_v41 = vpop.f32.mrb[77].mxu1 }
 0x687   :  { %v2651_v42 = vadd.f32 %v2650_v40, %v5834_v35  ;;  %v2724_v47 = vadd.f32 %v2723_v41, %v5837_v36  ;;  %v2652_v25 = vpop.f32.mrb[78].mxu0  ;;  %v2725_v48 = vpop.f32.mrb[78].mxu1 }
 0x688   :  { %v2762_v50 = vmax.f32 %v2722_v15, 0.0  ;;  %v2653_v51 = vadd.f32 %v2652_v25, %v5828_v33  ;;  %v2726_v52 = vadd.f32 %v2725_v48, %v5831_v34  ;;  %v2654_v53 = vpop.f32.mrb[79].mxu0  ;;  %v2727_v54 = vpop.f32.mrb[79].mxu1  ;;  %v2760_v44 = vmax.f32 %v2649_v39, 0.0 }
 0x689   :  { %v2763_v49 = vmax.f32 %v2724_v47, 0.0  ;;  %v2655_v43 = vadd.f32 %v2654_v53, %v5834_v35  ;;  %v2728_v55 = vadd.f32 %v2727_v54, %v5837_v36  ;;  %v2761_v56 = vmax.f32 %v2651_v42, 0.0 }
 0x68a   :  { %v2764_v45 = vmax.f32 %v2653_v51, 0.0  ;;  %v2766_v46 = vmax.f32 %v2726_v52, 0.0 }
 0x68b   :  { %v2765_v57 = vmax.f32 %v2655_v43, 0.0  ;;  %v2767_v61 = vmax.f32 %v2728_v55, 0.0 }
 0x68c   :  { %v2792_v5 = vpack.c.bf16 %v2764_v45, %v2760_v44  ;;  %v2794_v6 = vpack.c.bf16 %v2766_v46, %v2762_v50 }
 0x68d   :  { %v2793_v0 = vpack.c.bf16 %v2765_v57, %v2761_v56  ;;  %v2795_v7 = vpack.c.bf16 %v2767_v61, %v2763_v49  ;;  %v2658_v4 = vpop.f32.mrb[80].mxu0  ;;  %v2731_v8 = vpop.f32.mrb[80].mxu1 }
 0x68e   :  { %v2659_v9 = vadd.f32 %v2658_v4, %v5828_v33  ;;  %v2732_v10 = vadd.f32 %v2731_v8, %v5831_v34  ;;  %v2660_v11 = vpop.f32.mrb[81].mxu0  ;;  %v2733_v12 = vpop.f32.mrb[81].mxu1 }
 0x68f   :  { %v2661_v13 = vadd.f32 %v2660_v11, %v5834_v35  ;;  %v2734_v14 = vadd.f32 %v2733_v12, %v5837_v36  ;;  %v2662_v16 = vpop.f32.mrb[82].mxu0  ;;  %v2735_v17 = vpop.f32.mrb[82].mxu1  ;;  %3097 = vmatprep.mubr.bf16.mxu0 %v2793_v0  ;;  %3162 = vmatprep.mubr.bf16.mxu1 %v2795_v7 }
 0x690   :  { %v2770_v18 = vmax.f32 %v2732_v10, 0.0  ;;  %v2663_v19 = vadd.f32 %v2662_v16, %v5828_v33  ;;  %v2736_v20 = vadd.f32 %v2735_v17, %v5831_v34  ;;  %v2664_v21 = vpop.f32.mrb[83].mxu0  ;;  %v2737_v22 = vpop.f32.mrb[83].mxu1  ;;  %3098 = vmatmul.mubr.bf16.vlgmr.msra.gmra.mrb[92].mxu0 %v2792_v5  ;;  %3163 = vmatmul.mubr.bf16.vlgmr.msra.gmra.mrb[92].mxu1 %v2794_v6  ;;  %v2768_v27 = vmax.f32 %v2659_v9, 0.0 }
 0x691   :  { %v2771_v23 = vmax.f32 %v2734_v14, 0.0  ;;  %v2665_v24 = vadd.f32 %v2664_v21, %v5834_v35  ;;  %v2738_v26 = vadd.f32 %v2737_v22, %v5837_v36  ;;  %v2769_v30 = vmax.f32 %v2661_v13, 0.0 }
 0x692   :  { %v2772_v28 = vmax.f32 %v2663_v19, 0.0  ;;  %v2774_v29 = vmax.f32 %v2736_v20, 0.0 }
 0x693   :  { %v2773_v31 = vmax.f32 %v2665_v24, 0.0  ;;  %v2775_v32 = vmax.f32 %v2738_v26, 0.0 }
 0x694   :  { %v2796_v37 = vpack.c.bf16 %v2772_v28, %v2768_v27  ;;  %v2798_v38 = vpack.c.bf16 %v2774_v29, %v2770_v18 }
 0x695   :  { %v2797_v39 = vpack.c.bf16 %v2773_v31, %v2769_v30  ;;  %v2799_v15 = vpack.c.bf16 %v2775_v32, %v2771_v23  ;;  %v2668_v40 = vpop.f32.mrb[84].mxu0  ;;  %v2741_v41 = vpop.f32.mrb[84].mxu1 }
 0x696   :  { %v2669_v42 = vadd.f32 %v2668_v40, %v5828_v33  ;;  %v2742_v47 = vadd.f32 %v2741_v41, %v5831_v34  ;;  %v2670_v25 = vpop.f32.mrb[85].mxu0  ;;  %v2743_v48 = vpop.f32.mrb[85].mxu1 }
 0x697   :  { %v2671_v50 = vadd.f32 %v2670_v25, %v5834_v35  ;;  %v2744_v51 = vadd.f32 %v2743_v48, %v5837_v36  ;;  %v2672_v52 = vpop.f32.mrb[86].mxu0  ;;  %v2745_v53 = vpop.f32.mrb[86].mxu1  ;;  %3105 = vmatprep.mubr.bf16.mxu0 %v2797_v39  ;;  %3170 = vmatprep.mubr.bf16.mxu1 %v2799_v15 }
 0x698   :  { %v2778_v54 = vmax.f32 %v2742_v47, 0.0  ;;  %v2673_v49 = vadd.f32 %v2672_v52, %v5828_v33  ;;  %v2746_v43 = vadd.f32 %v2745_v53, %v5831_v34  ;;  %v2674_v55 = vpop.f32.mrb[87].mxu0  ;;  %v2747_v44 = vpop.f32.mrb[87].mxu1  ;;  %3106 = vmatmul.mubr.bf16.gmra.mrb[96].mxu0 %v2796_v37  ;;  %3171 = vmatmul.mubr.bf16.gmra.mrb[96].mxu1 %v2798_v38  ;;  %v2776_v57 = vmax.f32 %v2669_v42, 0.0 }
 0x699   :  { %v2779_v45 = vmax.f32 %v2744_v51, 0.0  ;;  %v2675_v46 = vadd.f32 %v2674_v55, %v5834_v35  ;;  %v2748_v56 = vadd.f32 %v2747_v44, %v5837_v36  ;;  %v2777_v6 = vmax.f32 %v2671_v50, 0.0  ;;  %v4229_v50 = vld [vmem:[%s6035_s3 + $0x240] sm:$0xff] }
 0x69a   :  { %v2780_v61 = vmax.f32 %v2673_v49, 0.0  ;;  %v2782_v5 = vmax.f32 %v2746_v43, 0.0  ;;  %v4233_v51 = vld [vmem:[%s6035_s3 + $0x260] sm:$0xff] }
 0x69b   :  { %v2781_v0 = vmax.f32 %v2675_v46, 0.0  ;;  %v2783_v7 = vmax.f32 %v2748_v56, 0.0  ;;  %v4258_v53 = vcombine.high %v4229_v50, %v4233_v51  ;;  %v4237_v49 = vld [vmem:[%s6035_s3 + $0x280] sm:$0x11]  ;;  %v5900_v56 = vld [vmem:[%s6036_s4 + $0x22] ss:$0 sm:$0xff] }
 0x69c   :  { %v2800_v4 = vpack.c.bf16 %v2780_v61, %v2776_v57  ;;  %v2802_v8 = vpack.c.bf16 %v2782_v5, %v2778_v54  ;;  %v4257_v54 = vcombine.low %v4229_v50, %v4233_v51  ;;  %v4266_v43 = vcombine.high %v4237_v49, %v4237_v49 }
 0x69d   :  { %v2801_v9 = vpack.c.bf16 %v2781_v0, %v2777_v6  ;;  %v2803_v10 = vpack.c.bf16 %v2783_v7, %v2779_v45  ;;  %v2678_v11 = vpop.f32.mrb[88].mxu0  ;;  %v2751_v12 = vpop.f32.mrb[88].mxu1  ;;  %v4265_v55 = vcombine.low %v4237_v49, %v4237_v49 }
 0x69e   :  { %v2679_v13 = vadd.f32 %v2678_v11, %v5828_v33  ;;  %v2752_v14 = vadd.f32 %v2751_v12, %v5831_v34  ;;  %v2680_v16 = vpop.f32.mrb[89].mxu0  ;;  %v2753_v17 = vpop.f32.mrb[89].mxu1 }
 0x69f   :  { %v2681_v18 = vadd.f32 %v2680_v16, %v5834_v35  ;;  %v2754_v19 = vadd.f32 %v2753_v17, %v5837_v36  ;;  %v2682_v20 = vpop.f32.mrb[90].mxu0  ;;  %v2755_v21 = vpop.f32.mrb[90].mxu1  ;;  %3113 = vmatprep.mubr.bf16.mxu0 %v2801_v9  ;;  %3178 = vmatprep.mubr.bf16.mxu1 %v2803_v10  ;;  %v3447_v44 = vsel %vm178_vm0, %v4265_v55, 0 }
 0x6a0   :  { %v2786_v22 = vmax.f32 %v2752_v14, 0.0  ;;  %v2683_v23 = vadd.f32 %v2682_v20, %v5828_v33  ;;  %v2756_v24 = vadd.f32 %v2755_v21, %v5831_v34  ;;  %v2684_v26 = vpop.f32.mrb[91].mxu0  ;;  %v2757_v27 = vpop.f32.mrb[91].mxu1  ;;  %3114 = vmatmul.mubr.bf16.gmra.mrb[100].mxu0 %v2800_v4  ;;  %3179 = vmatmul.mubr.bf16.gmra.mrb[100].mxu1 %v2802_v8  ;;  %v2784_v31 = vmax.f32 %v2679_v13, 0.0  ;;  %v4213_v34 = vld [vmem:[%s6035_s3 + $0x1c0] sm:$0xff] }
 0x6a1   :  { %v2787_v28 = vmax.f32 %v2754_v19, 0.0  ;;  %v2685_v29 = vadd.f32 %v2684_v26, %v5834_v35  ;;  %v2758_v30 = vadd.f32 %v2757_v27, %v5837_v36  ;;  %v2785_v38 = vmax.f32 %v2681_v18, 0.0  ;;  %v4217_v35 = vld [vmem:[%s6035_s3 + $0x1e0] sm:$0xff] }
 0x6a2   :  { %v2788_v32 = vmax.f32 %v2683_v23, 0.0  ;;  %v2790_v37 = vmax.f32 %v2756_v24, 0.0  ;;  %v4221_v36 = vld [vmem:[%s6035_s3 + $0x200] sm:$0xff]  ;;  %v4241_v47 = vcombine.low %v4213_v34, %v4217_v35  ;;  %v4242_v25 = vcombine.high %v4213_v34, %v4217_v35 }
 0x6a3   :  { %v2789_v39 = vmax.f32 %v2685_v29, 0.0  ;;  %v2791_v15 = vmax.f32 %v2758_v30, 0.0 }
 0x6a4   :  { %v2804_v40 = vpack.c.bf16 %v2788_v32, %v2784_v31  ;;  %v2806_v41 = vpack.c.bf16 %v2790_v37, %v2786_v22  ;;  %3470 = vmatprep.subr.bf16.mxu1 %v4242_v25 }
 0x6a5   :  { %v2805_v33 = vpack.c.bf16 %v2789_v39, %v2785_v38  ;;  %v2807_v42 = vpack.c.bf16 %v2791_v15, %v2787_v28  ;;  %3471 = vmatpush1.bf16.msra.mxu1 %v4241_v47 }
 0x6a7   :  { %3121 = vmatprep.mubr.bf16.mxu0 %v2805_v33  ;;  %3186 = vmatprep.mubr.bf16.mxu1 %v2807_v42 }
 0x6a8   :  { %3122 = vmatmul.mubr.bf16.gmra.mrb[104].mxu0 %v2804_v40  ;;  %3187 = vmatmul.mubr.bf16.gmra.mrb[104].mxu1 %v2806_v41 }
 0x6a9   :  { %4605 = vmatprep.mubr.msk.f32.mxu0 %vm4919_vm2, %v4920_v3  ;;  %3502 = vmatprep.mubr.bf16.mxu1 %v4917_v2  ;;  %v4225_v3 = vld [vmem:[%s6035_s3 + $0x220] sm:$0xff] }
 0x6aa   :  { %v4250_v48 = vcombine.high %v4221_v36, %v4225_v3  ;;  %v4249_v52 = vcombine.low %v4221_v36, %v4225_v3 }
 0x6ac   :  { %3472 = vmatprep.subr.bf16.mxu1 %v4250_v48 }
 0x6ad   :  { %3473 = vmatpush1.bf16.msra.mxu1 %v4249_v52 }
 0x6ae   :  { %3474 = vmatprep.subr.bf16.mxu1 %v4258_v53 }
 0x6b1   :  { %3475 = vmatpush1.bf16.msra.mxu1 %v4257_v54 }
 0x6b2   :  { %4273 = vmatprep.subr.msk.bf16.mxu1 %vm178_vm0, %v4266_v43 }
 0x6b5   :  { %3477 = vmatpush1.bf16.msra.mxu1 %v3447_v44 }
 0x763   :  { %v4478_v45 = vpop.f32.mrb[92].mxu0  ;;  %v4518_v46 = vpop.f32.mrb[92].mxu1 }
 0x764   :  { %v4479_v57 = vpop.f32.mrb[93].mxu0  ;;  %v4519_v61 = vpop.f32.mrb[93].mxu1 }
 0x765   :  { %v4480_v5 = vadd.f32 %v4479_v57, %v4478_v45  ;;  %v4520_v6 = vadd.f32 %v4519_v61, %v4518_v46  ;;  %v4481_v0 = vpop.f32.mrb[94].mxu0  ;;  %v4521_v7 = vpop.f32.mrb[94].mxu1 }
 0x766   :  { %v4482_v4 = vpop.f32.mrb[95].mxu0  ;;  %v4522_v8 = vpop.f32.mrb[95].mxu1 }
 0x767   :  { %v3100_v9 = vadd.f32 %v4480_v5, %v5900_v56  ;;  %v4483_v10 = vadd.f32 %v4482_v4, %v4481_v0  ;;  %v4523_v11 = vadd.f32 %v4522_v8, %v4521_v7 }
 0x769   :  { %v3165_v12 = vadd.f32 %v4520_v6, %v3100_v9  ;;  %v3103_v13 = vadd.f32 %v4483_v10, %v5900_v56 }
 0x76b   :  { %v3168_v14 = vadd.f32 %v4523_v11, %v3103_v13  ;;  %v4484_v16 = vpop.f32.mrb[96].mxu0  ;;  %v4524_v17 = vpop.f32.mrb[96].mxu1  ;;  %v3195_v20 = vmax.f32 %v3165_v12, 0.0 }
 0x76c   :  { %v4485_v18 = vpop.f32.mrb[97].mxu0  ;;  %v4525_v19 = vpop.f32.mrb[97].mxu1 }
 0x76d   :  { %v3196_v21 = vmax.f32 %v3168_v14, 0.0  ;;  %v4486_v22 = vadd.f32 %v4485_v18, %v4484_v16  ;;  %v4526_v23 = vadd.f32 %v4525_v19, %v4524_v17  ;;  %v4487_v24 = vpop.f32.mrb[98].mxu0  ;;  %v4527_v26 = vpop.f32.mrb[98].mxu1  ;;  %v4214_v17 = vld [vmem:[%s6035_s3 + $0x1c8] sm:$0xff] }
 0x76e   :  { %v4488_v27 = vpop.f32.mrb[99].mxu0  ;;  %v4528_v28 = vpop.f32.mrb[99].mxu1  ;;  %v4218_v18 = vld [vmem:[%s6035_s3 + $0x1e8] sm:$0xff] }
 0x76f   :  { %v4633_v29 = vpack.c.bf16 %v3196_v21, %v3195_v20  ;;  %v3108_v30 = vadd.f32 %v4486_v22, %v5900_v56  ;;  %v4489_v31 = vadd.f32 %v4488_v27, %v4487_v24  ;;  %v4529_v32 = vadd.f32 %v4528_v28, %v4527_v26  ;;  %v4230_v26 = vld [vmem:[%s6035_s3 + $0x248] sm:$0xff]  ;;  %v4892_v28 = vld [vmem:[%s6037_s5] sm:$0xff] }
 0x770   :  { %v4244_v21 = vcombine.high %v4214_v17, %v4218_v18  ;;  %v4234_v27 = vld [vmem:[%s6035_s3 + $0x268] sm:$0xff] }
 0x771   :  { %v3173_v37 = vadd.f32 %v4526_v23, %v3108_v30  ;;  %v3111_v38 = vadd.f32 %v4489_v31, %v5900_v56  ;;  %4634 = vmatpush3.bf16.msra.mxu0 %v4633_v29  ;;  %v4243_v23 = vcombine.low %v4214_v17, %v4218_v18  ;;  %v4260_v30 = vcombine.high %v4230_v26, %v4234_v27  ;;  %v4238_v31 = vld [vmem:[%s6035_s3 + $0x288] sm:$0x11] }
 0x772   :  { %4635 = vmatprep.subr.bf16.mxu0 %v4918_v1  ;;  %v4282_v17 = vld [vmem:[%s6036_s4 + $0x4] ss:$8 sm:$0xf0] }
 0x773   :  { %v3176_v39 = vadd.f32 %v4529_v32, %v3111_v38  ;;  %v4490_v15 = vpop.f32.mrb[100].mxu0  ;;  %v4530_v40 = vpop.f32.mrb[100].mxu1  ;;  %v3197_v42 = vmax.f32 %v3173_v37, 0.0  ;;  %v4259_v32 = vcombine.low %v4230_v26, %v4234_v27  ;;  %v4268_v37 = vcombine.high %v4238_v31, %v4238_v31 }
 0x774   :  { %v4491_v41 = vpop.f32.mrb[101].mxu0  ;;  %v4531_v33 = vpop.f32.mrb[101].mxu1  ;;  %v4267_v38 = vcombine.low %v4238_v31, %v4238_v31 }
 0x775   :  { %v3198_v34 = vmax.f32 %v3176_v39, 0.0  ;;  %v4492_v35 = vadd.f32 %v4491_v41, %v4490_v15  ;;  %v4532_v36 = vadd.f32 %v4531_v33, %v4530_v40  ;;  %v4493_v47 = vpop.f32.mrb[102].mxu0  ;;  %v4533_v25 = vpop.f32.mrb[102].mxu1  ;;  %v4215_v15 = vld [vmem:[%s6035_s3 + $0x1d0] sm:$0xff]  ;;  %v4216_v41 = vld [vmem:[%s6035_s3 + $0x1d8] sm:$0xff] }
 0x776   :  { %v4494_v3 = vpop.f32.mrb[103].mxu0  ;;  %v4534_v48 = vpop.f32.mrb[103].mxu1  ;;  %v3453_v39 = vsel %vm178_vm0, %v4267_v38, 0  ;;  %v4219_v40 = vld [vmem:[%s6035_s3 + $0x1f0] sm:$0xff] }
 0x777   :  { %v4636_v50 = vpack.c.bf16 %v3198_v34, %v3197_v42  ;;  %v3116_v51 = vadd.f32 %v4492_v35, %v5900_v56  ;;  %v4495_v52 = vadd.f32 %v4494_v3, %v4493_v47  ;;  %v4535_v53 = vadd.f32 %v4534_v48, %v4533_v25  ;;  %v4220_v42 = vld [vmem:[%s6035_s3 + $0x1f8] sm:$0xff]  ;;  %v4223_v47 = vld [vmem:[%s6035_s3 + $0x210] sm:$0xff] }
 0x778   :  { %v4246_v33 = vcombine.high %v4215_v15, %v4219_v40  ;;  %v4245_v34 = vcombine.low %v4215_v15, %v4219_v40  ;;  %v4247_v35 = vcombine.low %v4216_v41, %v4220_v42  ;;  %v4227_v25 = vld [vmem:[%s6035_s3 + $0x230] sm:$0xff]  ;;  %v4224_v3 = vld [vmem:[%s6035_s3 + $0x218] sm:$0xff] }
 0x779   :  { %v3181_v54 = vadd.f32 %v4532_v36, %v3116_v51  ;;  %v3119_v49 = vadd.f32 %v4495_v52, %v5900_v56  ;;  %4637 = vmatpush3.bf16.msra.mxu0 %v4636_v50  ;;  %v4248_v36 = vcombine.high %v4216_v41, %v4220_v42  ;;  %v4228_v48 = vld [vmem:[%s6035_s3 + $0x238] sm:$0xff] }
 0x77a   :  { %4638 = vmatprep.subr.bf16.mxu0 %v4918_v1  ;;  %3552 = vmatprep.subr.bf16.mxu1 %v4246_v33 }
 0x77b   :  { %v3184_v43 = vadd.f32 %v4535_v53, %v3119_v49  ;;  %v4496_v55 = vpop.f32.mrb[104].mxu0  ;;  %v4536_v44 = vpop.f32.mrb[104].mxu1  ;;  %v3199_v57 = vmax.f32 %v3181_v54, 0.0  ;;  %v4254_v53 = vcombine.high %v4223_v47, %v4227_v25  ;;  %v4256_v54 = vcombine.high %v4224_v3, %v4228_v48  ;;  %v4231_v49 = vld [vmem:[%s6035_s3 + $0x250] sm:$0xff] }
 0x77c   :  { %v4497_v45 = vpop.f32.mrb[105].mxu0  ;;  %v4537_v46 = vpop.f32.mrb[105].mxu1 }
 0x77d   :  { %v3200_v61 = vmax.f32 %v3184_v43, 0.0  ;;  %v4498_v5 = vadd.f32 %v4497_v45, %v4496_v55  ;;  %v4538_v6 = vadd.f32 %v4537_v46, %v4536_v44  ;;  %v4499_v0 = vpop.f32.mrb[106].mxu0  ;;  %v4539_v7 = vpop.f32.mrb[106].mxu1  ;;  %v4235_v43 = vld [vmem:[%s6035_s3 + $0x270] sm:$0xff]  ;;  %v4232_v55 = vld [vmem:[%s6035_s3 + $0x258] sm:$0xff]  ;;  %v4253_v45 = vcombine.low %v4223_v47, %v4227_v25 }
 0x77e   :  { %v4500_v4 = vpop.f32.mrb[107].mxu0  ;;  %v4540_v8 = vpop.f32.mrb[107].mxu1  ;;  %v4236_v44 = vld [vmem:[%s6035_s3 + $0x278] sm:$0xff]  ;;  %v4255_v46 = vcombine.low %v4224_v3, %v4228_v48  ;;  %v1232_v25 = vsub.s32 4, %v5128_v58 }
 0x77f   :  { %v4639_v9 = vpack.c.bf16 %v3200_v61, %v3199_v57  ;;  %v3124_v10 = vadd.f32 %v4498_v5, %v5900_v56  ;;  %v4501_v11 = vadd.f32 %v4500_v4, %v4499_v0  ;;  %v4541_v12 = vadd.f32 %v4540_v8, %v4539_v7  ;;  %v4239_v5 = vld [vmem:[%s6035_s3 + $0x290] sm:$0x11] }
 0x780   :  { %v4262_v57 = vcombine.high %v4231_v49, %v4235_v43  ;;  %v4264_v61 = vcombine.high %v4232_v55, %v4236_v44  ;;  %v4261_v0 = vcombine.low %v4231_v49, %v4235_v43  ;;  %v4263_v7 = vcombine.low %v4232_v55, %v4236_v44 }
 0x781   :  { %v3189_v13 = vadd.f32 %v4538_v6, %v3124_v10  ;;  %v3127_v14 = vadd.f32 %v4501_v11, %v5900_v56  ;;  %4640 = vmatpush3.bf16.msra.mxu0 %v4639_v9  ;;  %v4222_v56 = vld [vmem:[%s6035_s3 + $0x208] sm:$0xff]  ;;  %v4240_v6 = vld [vmem:[%s6035_s3 + $0x298] sm:$0x11]  ;;  %v4270_v4 = vcombine.high %v4239_v5, %v4239_v5  ;;  %v4269_v9 = vcombine.low %v4239_v5, %v4239_v5 }
 0x782   :  { %4641 = vmatprep.subr.bf16.mxu0 %v4918_v1  ;;  %v4226_v1 = vld [vmem:[%s6035_s3 + $0x228] sm:$0xff]  ;;  %v4272_v8 = vcombine.high %v4240_v6, %v4240_v6  ;;  %v4271_v10 = vcombine.low %v4240_v6, %v4240_v6 }
 0x783   :  { %v3192_v16 = vadd.f32 %v4541_v12, %v3127_v14  ;;  %v3201_v19 = vmax.f32 %v3189_v13, 0.0  ;;  %v4252_v24 = vcombine.high %v4222_v56, %v4226_v1  ;;  %v4251_v29 = vcombine.low %v4222_v56, %v4226_v1  ;;  %v3740_v12 = vld [vmem:[%s6036_s4 + $0x3] ss:$8 sm:$0xf] }
 0x784   :  { %v3459_v11 = vsel %vm178_vm0, %v4269_v9, 0  ;;  %v3741_v13 = vld [vmem:[%s6036_s4 + $0x3] ss:$8 sm:$0xf0] }
 0x785   :  { %v3202_v20 = vmax.f32 %v3192_v16, 0.0  ;;  %v29_v14 = vor.u32 %v3741_v13, %v3740_v12  ;;  %v4281_v16 = vld [vmem:[%s6036_s4 + $0x4] ss:$8 sm:$0xf] }
 0x787   :  { %v4642_v22 = vpack.c.bf16 %v3202_v20, %v3201_v19  ;;  %v1217_v18 = vrot.slane %v29_v14, %v5131_v59  ;;  %v3653_v19 = vor.u32 %v4282_v17, %v4281_v16  ;;  %v1225_v20 = vrot.slane %v29_v14, %v5134_v60 }
 0x789   :  { %4643 = vmatpush3.bf16.msra.mxu0 %v4642_v22  ;;  %v1229_v22 = vrot.slane %v29_v14, %v5143_v63  ;;  %v3667_v41 = vrot.slane %v3653_v19, %v5134_v60  ;;  %v1233_v60 = vrot.slane %v29_v14, %v1232_v25  ;;  %v3675_v44 = vrot.slane %v3653_v19, %v1232_v25 }
 0x78a   :  { %3511 = vmatprep.subr.bf16.mxu0 %v4244_v21  ;;  %v1221_v21 = vrot.slane %v29_v14, %v5140_v62 }
 0x78c   :  { %4606 = vmatmul.mubr.msk.f32.vlgmr.msra.gmra.mrb[34].mxu0 %vm779_vm3, %v4892_v28 }
 0x78d   :  { %3512 = vmatpush1.bf16.msra.mxu0 %v4243_v23  ;;  %3543 = vmatprep.mubr.bf16.mxu0 %v4917_v2 }
 0x78e   :  { %3513 = vmatprep.subr.bf16.mxu0 %v4252_v24  ;;  %v3659_v24 = vrot.slane %v3653_v19, %v5131_v59  ;;  %v3671_v59 = vrot.slane %v3653_v19, %v5143_v63 }
 0x791   :  { %3514 = vmatpush1.bf16.msra.mxu0 %v4251_v29 }
 0x792   :  { %3515 = vmatprep.subr.bf16.mxu0 %v4260_v30  ;;  %v3663_v30 = vrot.slane %v3653_v19, %v5140_v62  ;;  %v1240_v62 = vsub.s32 6, %v5128_v58 }
 0x795   :  { %3516 = vmatpush1.bf16.msra.mxu0 %v4259_v32 }
 0x796   :  { %4275 = vmatprep.subr.msk.bf16.mxu0 %vm178_vm0, %v4268_v37 }
 0x799   :  { %3518 = vmatpush1.bf16.msra.mxu0 %v3453_v39 }
 0x79a   :  { %3593 = vmatprep.subr.bf16.mxu0 %v4248_v36 }
 0x85f   :  { %v3269_v50 = vpop.f32.mrb[34].mxu0 }
 0x860   :  { %v3273_v51 = vpack.c.bf16 %v3269_v50, %v3269_v50  ;;  %v4607_v52 = vpop.f32.mrb[35].mxu0  ;;  %v1236_v50 = vsub.s32 5, %v5128_v58 }
 0x862   :  { %4274 = vmatmul.mubr.msk.bf16.vlgmr.msra.gmra.mrb[32].mxu1 %vm165_vm1, %v3273_v51  ;;  %4276 = vmatmul.mubr.msk.bf16.vlgmr.msra.gmra.mrb[36].mxu0 %vm165_vm1, %v3273_v51  ;;  %v3679_v5 = vrot.slane %v3653_v19, %v1236_v50 }
 0x863   :  { %3553 = vmatpush1.bf16.msra.mxu1 %v4245_v34  ;;  %3594 = vmatpush1.bf16.msra.mxu0 %v4247_v35 }
 0x864   :  { %3554 = vmatprep.subr.bf16.mxu1 %v4254_v53  ;;  %3595 = vmatprep.subr.bf16.mxu0 %v4256_v54  ;;  %v1241_v53 = vrot.slane %v29_v14, %v1240_v62  ;;  %v1237_v54 = vrot.slane %v29_v14, %v1236_v50 }
 0x865   :  { %3584 = vmatprep.mubr.bf16.mxu1 %v4917_v2  ;;  %3625 = vmatprep.mubr.bf16.mxu0 %v4917_v2  ;;  %v3465_v2 = vsel %vm178_vm0, %v4271_v10, 0 }
 0x867   :  { %3555 = vmatpush1.bf16.msra.mxu1 %v4253_v45  ;;  %3596 = vmatpush1.bf16.msra.mxu0 %v4255_v46 }
 0x868   :  { %3556 = vmatprep.subr.bf16.mxu1 %v4262_v57  ;;  %3597 = vmatprep.subr.bf16.mxu0 %v4264_v61 }
 0x86b   :  { %3557 = vmatpush1.bf16.msra.mxu1 %v4261_v0  ;;  %3598 = vmatpush1.bf16.msra.mxu0 %v4263_v7 }
 0x86c   :  { %4277 = vmatprep.subr.msk.bf16.mxu1 %vm178_vm0, %v4270_v4  ;;  %4279 = vmatprep.subr.msk.bf16.mxu0 %vm178_vm0, %v4272_v8 }
 0x86f   :  { %3559 = vmatpush1.bf16.msra.mxu1 %v3459_v11  ;;  %3600 = vmatpush1.bf16.msra.mxu0 %v3465_v2  ;;  %v3683_v2 = vrot.slane %v3653_v19, %v1240_v62 }
 0x872   :  { %4278 = vmatmul.mubr.msk.bf16.vlgmr.msra.gmra.mrb[36].mxu1 %vm165_vm1, %v3273_v51  ;;  %4280 = vmatmul.mubr.msk.bf16.vlgmr.msra.gmra.mrb[40].mxu0 %vm165_vm1, %v3273_v51  ;;  %v1244_v51 = vsub.s32 7, %v5128_v58 }
 0x874   :  { %v1245_v49 = vrot.slane %v29_v14, %v1244_v51  ;;  %v3687_v16 = vrot.slane %v3653_v19, %v1244_v51 }
 0x935   :  { %v3504_v56 = vpop.f32.mrb[32].mxu1  ;;  %v3545_v1 = vpop.f32.mrb[36].mxu0 }
 0x936   :  { %v4644_v23 = vadd.f32 %v3504_v56, %v1217_v18  ;;  %v4646_v26 = vadd.f32 %v3545_v1, %v1225_v20  ;;  %v3506_v27 = vpop.f32.mrb[33].mxu1  ;;  %v3547_v28 = vpop.f32.mrb[37].mxu0  ;;  %v3654_v56 = vld [vmem:[%s6036_s4 + $0x5] ss:$0 sm:$0xff] }
 0x937   :  { %v4645_v29 = vadd.f32 %v3506_v27, %v1221_v21  ;;  %v4647_v31 = vadd.f32 %v3547_v28, %v1229_v22  ;;  %v3508_v32 = vpop.f32.mrb[34].mxu1  ;;  %v3549_v37 = vpop.f32.mrb[38].mxu0 }
 0x938   :  { %v3642_v38 = vmax.f32 %v4644_v23, 0.0  ;;  %v3509_v39 = vpop.f32.mrb[35].mxu1  ;;  %v3550_v15 = vpop.f32.mrb[39].mxu0  ;;  %v3644_v40 = vmax.f32 %v4646_v26, 0.0 }
 0x939   :  { %v3643_v33 = vmax.f32 %v4645_v29, 0.0  ;;  %v3645_v35 = vmax.f32 %v4647_v31, 0.0 }
 0x93a   :  { %v3696_v42 = vmul.f32 %v3659_v24, %v3642_v38  ;;  %v3698_v36 = vmul.f32 %v3667_v41, %v3644_v40 }
 0x93b   :  { %v3697_v34 = vmul.f32 %v3663_v30, %v3643_v33  ;;  %v3699_v3 = vmul.f32 %v3671_v59, %v3645_v35 }
 0x93d   :  { %v3704_v47 = vadd.f32 %v3697_v34, %v3696_v42 }
 0x93f   :  { %v3705_v48 = vadd.f32 %v3704_v47, %v3698_v36 }
 0x941   :  { %v3706_v52 = vadd.f32 %v3705_v48, %v3699_v3 }
 0x945   :  { %v3586_v43 = vpop.f32.mrb[36].mxu1  ;;  %v3627_v55 = vpop.f32.mrb[40].mxu0 }
 0x946   :  { %v4648_v63 = vadd.f32 %v3586_v43, %v1233_v60  ;;  %v4650_v45 = vadd.f32 %v3627_v55, %v1241_v53  ;;  %v3588_v46 = vpop.f32.mrb[37].mxu1  ;;  %v3629_v57 = vpop.f32.mrb[41].mxu0 }
 0x947   :  { %v4649_v61 = vadd.f32 %v3588_v46, %v1237_v54  ;;  %v3590_v6 = vpop.f32.mrb[38].mxu1  ;;  %v3631_v0 = vpop.f32.mrb[42].mxu0  ;;  %v4651_v4 = vadd.f32 %v3629_v57, %v1245_v49 }
 0x948   :  { %v3646_v7 = vmax.f32 %v4648_v63, 0.0  ;;  %v3591_v8 = vpop.f32.mrb[39].mxu1  ;;  %v3632_v58 = vpop.f32.mrb[43].mxu0  ;;  %v3648_v11 = vmax.f32 %v4650_v45, 0.0 }
 0x949   :  { %v3647_v9 = vmax.f32 %v4649_v61, 0.0  ;;  %v3649_v14 = vmax.f32 %v4651_v4, 0.0 }
 0x94a   :  { %v3700_v10 = vmul.f32 %v3675_v44, %v3646_v7  ;;  %v3702_v17 = vmul.f32 %v3683_v2, %v3648_v11 }
 0x94b   :  { %v3701_v12 = vmul.f32 %v3679_v5, %v3647_v9  ;;  %v3703_v20 = vmul.f32 %v3687_v16, %v3649_v14 }
 0x94c   :  { %v3707_v13 = vadd.f32 %v3706_v52, %v3700_v10 }
 0x94e   :  { %v3708_v18 = vadd.f32 %v3707_v13, %v3701_v12 }
 0x950   :  { %v3709_v21 = vadd.f32 %v3708_v18, %v3702_v17 }
 0x952   :  { %v3710_v22 = vadd.f32 %v3709_v21, %v3703_v20 }
 0x954   :  { %3711 = vadd.xlane.f32.xlu0 %v3710_v22 }
 0x9e1   :  { %v3712_v1 = vpop.xlane.xlu0 %3711 }
 0x9e2   :  { %v3713_v23 = vadd.f32 %v3712_v1, %v3654_v56 }
 0x9e4   :  { %v4283_v24 = vmul.f32 -1.442695, %v3713_v23 }
 0x9e6   :  { %4888 = vpow2.f32 %v4283_v24 }
 0x9f0   :  { %v4889_v26 = vpop.eup %4888 }
 0x9f1   :  { %v3717_v27 = vadd.f32 1.0, %v4889_v26 }
 0x9f3   :  { %4890 = vrcp.f32 %v3717_v27 }
 0x9fd   :  { %v4891_v28 = vpop.eup %4890 }
 0x9fe   :  { %3722 = vperm.xlu0 %4689, %v4891_v28  }
 0xa7d   :  { %v3723_v19 = vpop.permute.xlu0 %3722 }
 0xa7e   :  { %3725 = vst [vmem:[#allocation2] sm:$0xff] %v3723_v19 }
 0xa7f   :  { %4904 = shalt.err (!%p4901_p4)
}
 0xa80   :  { %s4905_s23 = scalar_lea.hbm %s6038_s6, 128 }
 0xa81   :  { %p4906_p5 = scmp.ne.s32.totalorder %s6038_s6, %s4905_s23  ;;  %p4909_p6 = scmp.lt.u32.totalorder %s4905_s23, %s6038_s6 }
 0xa83   :  { %p4911_p7 = pnand %p4909_p6, %p4906_p5 }
 0xa85   :  { %4914 = shalt.err (!%p4911_p7)
}
 0xa86   :  { %3735 = dma.vmem_to_hbm [thread:$0]  %s3733_s20, 128, %s6038_s6, [#allocation3]  }
 0xa87   :  { %4915 = dma.done.wait [#allocation3], 128  }
 0xa88   :  { %4916 = vsyncadd [#allocation3], 4294967168 }
 0xa89   :  { %3739 = vsyncpa [#allocation3], 1 }

</bundles_post_ra>
